<compile_context>
chip_gen: v5e
topology: v5e:2x2
jax: 0.10.0
libtpu: 0.0.40
codegen_flags: <defaults>
</compile_context>

<pallas_src>
import jax
import jax.numpy as jnp
from jax import lax
from jax.experimental import pallas as pl
from jax.experimental.pallas import tpu as pltpu


BATCH_BLOCK_MAX = 256   # rows of the batch processed per grid block
TIME_CHUNK_MAX = 32     # timesteps whose input projection is resident at once


def _round_up(x, m):
    return pl.cdiv(x, m) * m


def lstm_kernel(x_ref, wih_ref, whh_ref, b_ref, h_out_ref, xg_sc, h_sc, c_sc):
    """One (batch-block, time-chunk) step of the LSTM recurrence.

    x_ref    : (1, TC*BB, E)  bf16 embedded inputs, time-major within the block
                              (row s*BB + b == chunk-local step s, batch row b)
    wih_ref  : (E, 4Hp)       bf16 fused input->gate weights (gate order i,f,g,o)
    whh_ref  : (Hp, 4Hp)      bf16 fused hidden->gate weights
    b_ref    : (1, 4Hp)       f32 fused bias (b_ih + b_hh), zero-padded per gate
    h_out_ref: (BB, Hp)       f32 h_T for this batch block (written at last chunk)
    xg_sc    : (TC*BB, 4Hp)   f32 scratch: X @ W_ih + b for this time chunk
    h_sc,c_sc: (BB, Hp)       f32 scratch: recurrent state carried across chunks
    """
    t_idx = pl.program_id(1)
    n_chunks = pl.num_programs(1)
    Hp = whh_ref.shape[0]
    BB = h_out_ref.shape[0]
    TC = xg_sc.shape[0] // BB

    @pl.when(t_idx == 0)
    def _():
        h_sc[...] = jnp.zeros_like(h_sc)
        c_sc[...] = jnp.zeros_like(c_sc)

    # Time-parallel, lane-dense input projection for this whole time chunk:
    # bf16 MXU operands, f32 accumulation + f32 bias.
    xg_sc[...] = (
        jnp.dot(x_ref[0], wih_ref[...], preferred_element_type=jnp.float32)
        + b_ref[...])

    whh = whh_ref[...]   # hoisted: loaded once per chunk, reused TC times (bf16)

    def step(s, carry):
        h, c = carry
        row = pl.multiple_of(s * BB, BB)
        g = (xg_sc[pl.ds(row, BB), :]
             + jnp.dot(h.astype(whh.dtype), whh,
                       preferred_element_type=jnp.float32))
        # Hp is a multiple of 128 -> each gate slice is whole-vreg lane-aligned.
        i_g = jax.nn.sigmoid(g[:, 0 * Hp:1 * Hp])
        f_g = jax.nn.sigmoid(g[:, 1 * Hp:2 * Hp])
        g_g = jnp.tanh(g[:, 2 * Hp:3 * Hp])
        o_g = jax.nn.sigmoid(g[:, 3 * Hp:4 * Hp])
        c_new = f_g * c + i_g * g_g
        h_new = o_g * jnp.tanh(c_new)
        return h_new, c_new

    # h / c live in vregs across the chunk; bounded unroll keeps vreg pressure
    # and compile time in check at large T.
    h_t, c_t = lax.fori_loop(0, TC, step, (h_sc[...], c_sc[...]),
                             unroll=min(TC, 8))
    h_sc[...] = h_t
    c_sc[...] = c_t

    @pl.when(t_idx == n_chunks - 1)
    def _():
        h_out_ref[...] = h_t


def _pad_gates(w, H, Hp, pad_rows=False):
    """Zero-pad fused (.., 4H) gate weights to (.., 4Hp), gate blocks preserved."""
    rows = w.shape[0]
    w3 = w.reshape(rows, 4, H)
    w3 = jnp.pad(w3, ((0, 0), (0, 0), (0, Hp - H)))
    w2 = w3.reshape(rows, 4 * Hp)
    if pad_rows:
        w2 = jnp.pad(w2, ((0, Hp - rows), (0, 0)))
    return w2


def text_rnn_forward(x_tokens, params):
    """Full TextRNN forward: embedding gather (glue) + Pallas LSTM kernel +
    tiny classifier in the wrapper (lane-sparse L stays out of the kernel)."""
    B, T = x_tokens.shape
    E = params["w_ih"].shape[0]
    H = params["w_hh"].shape[0]

    # Hidden padded to a lane multiple (exact: padded units stay identically 0).
    Hp = _round_up(H, 128)
    # One batch block for the whole (padded) batch when it fits, else 256-row
    # blocks; the grid's batch axis is "parallel" so v7x's two TCs split it.
    BB = min(_round_up(B, 8), BATCH_BLOCK_MAX)
    b_pad = _round_up(B, BB)
    nb = b_pad // BB
    # Largest time chunk <= TIME_CHUNK_MAX that divides T.
    TC = min(T, TIME_CHUNK_MAX)
    while T % TC:
        TC -= 1
    nt = T // TC

    # Fused, per-gate zero-padded weights; bf16 for the MXU operands only.
    wih = _pad_gates(params["w_ih"], H, Hp).astype(jnp.bfloat16)            # (E, 4Hp)
    whh = _pad_gates(params["w_hh"], H, Hp, pad_rows=True).astype(jnp.bfloat16)  # (Hp, 4Hp)
    b = _pad_gates(params["b"], H, Hp)                                      # (1, 4Hp) f32

    # Pad batch to a multiple of BB and gather the embedding directly into a
    # (nb, T*BB, E) time-major, batch-blocked layout (transpose the tiny int32
    # token matrix, never the activations).
    tok = jnp.pad(x_tokens, ((0, b_pad - B), (0, 0)))        # (b_pad, T)
    tok = tok.reshape(nb, BB, T).transpose(0, 2, 1)          # (nb, T, BB)
    x = jnp.take(params["embed"], tok, axis=0)               # (nb, T, BB, E)
    x = x.reshape(nb, T * BB, E).astype(jnp.bfloat16)

    const = lambda i, t: (0, 0)
    h_last = pl.pallas_call(
        lstm_kernel,
        out_shape=jax.ShapeDtypeStruct((b_pad, Hp), jnp.float32),
        grid_spec=pltpu.PrefetchScalarGridSpec(
            num_scalar_prefetch=0,
            grid=(nb, nt),
            in_specs=[
                pl.BlockSpec((1, TC * BB, E), lambda i, t: (i, t, 0)),  # x chunk
                pl.BlockSpec((E, 4 * Hp), const),                       # w_ih
                pl.BlockSpec((Hp, 4 * Hp), const),                      # w_hh
                pl.BlockSpec((1, 4 * Hp), const),                       # bias
            ],
            out_specs=pl.BlockSpec((BB, Hp), lambda i, t: (i, 0)),      # h_T
            scratch_shapes=[
                pltpu.VMEM((TC * BB, 4 * Hp), jnp.float32),  # xg for this chunk
                pltpu.VMEM((BB, Hp), jnp.float32),           # h carry
                pltpu.VMEM((BB, Hp), jnp.float32),           # c carry
            ],
        ),
        compiler_params=pltpu.CompilerParams(
            dimension_semantics=("parallel", "arbitrary")),
    )(x, wih, whh, b)

    # out = Linear(output[:, -1, :]) == Linear(h_T) for uni-dir single layer.
    h_last = h_last[:B, :H]
    return h_last @ params["w_out"] + params["b_out"]


def ref_forward(x_tokens, params):
    """Pure-JAX reference mirroring the kernel's MXU operand precision
    (bf16 matmul operands, f32 accumulation, f32 gate math)."""
    emb = jnp.take(params["embed"], x_tokens, axis=0)        # (B, T, E) f32
    B, T, E = emb.shape
    H = params["w_hh"].shape[0]
    wih = params["w_ih"].astype(jnp.bfloat16)
    whh = params["w_hh"].astype(jnp.bfloat16)
    h = jnp.zeros((B, H), jnp.float32)
    c = jnp.zeros((B, H), jnp.float32)
    for t in range(T):
        xg = jnp.dot(emb[:, t, :].astype(jnp.bfloat16), wih,
                     preferred_element_type=jnp.float32)
        hg = jnp.dot(h.astype(jnp.bfloat16), whh,
                     preferred_element_type=jnp.float32)
        g = xg + hg + params["b"]
        i_g = jax.nn.sigmoid(g[:, 0 * H:1 * H])
        f_g = jax.nn.sigmoid(g[:, 1 * H:2 * H])
        g_g = jnp.tanh(g[:, 2 * H:3 * H])
        o_g = jax.nn.sigmoid(g[:, 3 * H:4 * H])
        c = f_g * c + i_g * g_g
        h = o_g * jnp.tanh(c)
    return h @ params["w_out"] + params["b_out"]


def init_params(key, vocab_size, embed_size, hidden_size, label_num):
    """Deterministic params mirroring the module's __init__ shapes.

    LSTM weights are stored fused & transposed: (in, 4H) with PyTorch gate
    order i, f, g, o concatenated along the last axis; b = b_ih + b_hh.
    """
    ks = jax.random.split(key, 6)
    scale = 1.0 / jnp.sqrt(jnp.float32(hidden_size))
    return {
        # nn.Embedding(vocab_size, embed_size)
        "embed": jax.random.normal(ks[0], (vocab_size, embed_size), jnp.float32),
        # nn.LSTM(embed_size, hidden_size, 1, batch_first=True), fused gates
        "w_ih": scale * jax.random.normal(
            ks[1], (embed_size, 4 * hidden_size), jnp.float32),
        "w_hh": scale * jax.random.normal(
            ks[2], (hidden_size, 4 * hidden_size), jnp.float32),
        "b": scale * jax.random.normal(
            ks[3], (1, 4 * hidden_size), jnp.float32),
        # nn.Linear(hidden_size * num_direction, label_num), stored transposed
        "w_out": scale * jax.random.normal(
            ks[4], (hidden_size, label_num), jnp.float32),
        "b_out": scale * jax.random.normal(
            ks[5], (1, label_num), jnp.float32),
    }


if __name__ == "__main__":
    # Small config consistent with the module's forward:
    VOCAB, EMBED, HIDDEN, LABELS = 50, 32, 32, 4
    BATCH, SEQ = 2, 8

    key = jax.random.PRNGKey(0)
    k_params, k_tokens = jax.random.split(key)
    params = init_params(k_params, VOCAB, EMBED, HIDDEN, LABELS)
    x_tokens = jax.random.randint(k_tokens, (BATCH, SEQ), 0, VOCAB, dtype=jnp.int32)

    logits = jax.block_until_ready(text_rnn_forward(x_tokens, params))
    ref = jax.block_until_ready(ref_forward(x_tokens, params))

    assert logits.shape == (BATCH, LABELS)
    assert jnp.allclose(logits, ref, atol=2e-3, rtol=2e-3), (logits, ref)
    print("KERNEL_OK")
</pallas_src>

<mosaic_0001>
module attributes {stable_mosaic.version = 11 : i64} {
  func.func @lstm_kernel(%arg0: i32, %arg1: i32, %arg2: memref<1x64x32xbf16, #tpu.memory_space<vmem>>, %arg3: memref<32x512xbf16, #tpu.memory_space<vmem>>, %arg4: memref<128x512xbf16, #tpu.memory_space<vmem>>, %arg5: memref<1x512xf32, #tpu.memory_space<vmem>>, %arg6: memref<8x128xf32, #tpu.memory_space<vmem>>, %arg7: memref<64x512xf32, #tpu.memory_space<vmem>>, %arg8: memref<8x128xf32, #tpu.memory_space<vmem>>, %arg9: memref<8x128xf32, #tpu.memory_space<vmem>>) attributes {dimension_semantics = [#tpu.dimension_semantics<parallel>, #tpu.dimension_semantics<arbitrary>], iteration_bounds = array<i64: 1, 1>, scalar_prefetch = 0 : i64, scratch_operands = 3 : i64, tpu.core_type = #tpu.core_type<tc>, window_params = [{transform_indices = @transform_0, window_bounds = array<i64: 1, 64, 32>}, {pipeline_mode = #tpu.pipeline_mode<synchronous>, transform_indices = @transform_1, window_bounds = array<i64: 32, 512>}, {pipeline_mode = #tpu.pipeline_mode<synchronous>, transform_indices = @transform_2, window_bounds = array<i64: 128, 512>}, {pipeline_mode = #tpu.pipeline_mode<synchronous>, transform_indices = @transform_3, window_bounds = array<i64: 1, 512>}, {transform_indices = @transform_4, window_bounds = array<i64: 8, 128>}]} {
    %c0_i32 = arith.constant 0 : i32
    %0 = arith.cmpi eq, %arg1, %c0_i32 : i32
    %1 = arith.extui %0 : i1 to i32
    %c0_i32_0 = arith.constant 0 : i32
    %2 = arith.cmpi ne, %1, %c0_i32_0 : i32
    scf.if %2 {
      %cst_70 = arith.constant 0.000000e+00 : f32
      %275 = vector.broadcast %cst_70 : f32 to vector<8x128xf32>
      %c0_71 = arith.constant 0 : index
      %c0_72 = arith.constant 0 : index
      %276 = vector.load %arg8[%c0_71, %c0_72] : memref<8x128xf32, #tpu.memory_space<vmem>>, vector<8x128xf32>
      tpu.vector_store %arg8[%c0_71, %c0_72], %275 {strides = array<i32>} : memref<8x128xf32, #tpu.memory_space<vmem>>, vector<8x128xf32>,
      %cst_73 = arith.constant 0.000000e+00 : f32
      %277 = vector.broadcast %cst_73 : f32 to vector<8x128xf32>
      %c0_74 = arith.constant 0 : index
      %c0_75 = arith.constant 0 : index
      %278 = vector.load %arg9[%c0_74, %c0_75] : memref<8x128xf32, #tpu.memory_space<vmem>>, vector<8x128xf32>
      tpu.vector_store %arg9[%c0_74, %c0_75], %277 {strides = array<i32>} : memref<8x128xf32, #tpu.memory_space<vmem>>, vector<8x128xf32>,
    } else {
    }
    %c0 = arith.constant 0 : index
    %c0_1 = arith.constant 0 : index
    %c0_2 = arith.constant 0 : index
    %3 = vector.load %arg2[%c0, %c0_1, %c0_2] : memref<1x64x32xbf16, #tpu.memory_space<vmem>>, vector<1x64x32xbf16>
    %4 = vector.shape_cast %3 : vector<1x64x32xbf16> to vector<64x32xbf16>
    %c0_3 = arith.constant 0 : index
    %c0_4 = arith.constant 0 : index
    %5 = vector.load %arg3[%c0_3, %c0_4] : memref<32x512xbf16, #tpu.memory_space<vmem>>, vector<32x512xbf16>
    %cst = arith.constant dense<0.000000e+00> : vector<64x512xf32>
    %6 = tpu.matmul %4, %5, %cst {dimension_numbers = #tpu.dot_dimension_numbers<[1], [0], [0], [1], [0, 0, 1, 1], [], []>} : vector<64x32xbf16>, vector<32x512xbf16>, vector<64x512xf32> -> vector<64x512xf32>
    %c0_5 = arith.constant 0 : index
    %c0_6 = arith.constant 0 : index
    %7 = vector.load %arg5[%c0_5, %c0_6] : memref<1x512xf32, #tpu.memory_space<vmem>>, vector<1x512xf32>
    %8 = vector.broadcast %7 : vector<1x512xf32> to vector<64x512xf32>
    %9 = arith.addf %6, %8 : vector<64x512xf32>
    %c0_7 = arith.constant 0 : index
    %c0_8 = arith.constant 0 : index
    %10 = vector.load %arg7[%c0_7, %c0_8] : memref<64x512xf32, #tpu.memory_space<vmem>>, vector<64x512xf32>
    tpu.vector_store %arg7[%c0_7, %c0_8], %9 {strides = array<i32>} : memref<64x512xf32, #tpu.memory_space<vmem>>, vector<64x512xf32>,
    %c0_9 = arith.constant 0 : index
    %c0_10 = arith.constant 0 : index
    %11 = vector.load %arg4[%c0_9, %c0_10] : memref<128x512xbf16, #tpu.memory_space<vmem>>, vector<128x512xbf16>
    %c0_11 = arith.constant 0 : index
    %c0_12 = arith.constant 0 : index
    %12 = vector.load %arg8[%c0_11, %c0_12] : memref<8x128xf32, #tpu.memory_space<vmem>>, vector<8x128xf32>
    %c0_13 = arith.constant 0 : index
    %c0_14 = arith.constant 0 : index
    %13 = vector.load %arg9[%c0_13, %c0_14] : memref<8x128xf32, #tpu.memory_space<vmem>>, vector<8x128xf32>
    %c0_i32_15 = arith.constant 0 : i32
    %c8_i32 = arith.constant 8 : i32
    %14 = arith.muli %c0_i32_15, %c8_i32 : i32
    %15 = tpu.assume_multiple %14, 8 : i32
    %16 = arith.index_cast %15 : i32 to index
    %c0_16 = arith.constant 0 : index
    %17 = vector.load %arg7[%16, %c0_16] : memref<64x512xf32, #tpu.memory_space<vmem>>, vector<8x512xf32>
    %18 = arith.truncf %12 : vector<8x128xf32> to vector<8x128xbf16>
    %cst_17 = arith.constant dense<0.000000e+00> : vector<8x512xf32>
    %19 = tpu.matmul %18, %11, %cst_17 {dimension_numbers = #tpu.dot_dimension_numbers<[1], [0], [0], [1], [0, 0, 1, 1], [], []>} : vector<8x128xbf16>, vector<128x512xbf16>, vector<8x512xf32> -> vector<8x512xf32>
    %20 = arith.addf %17, %19 : vector<8x512xf32>
    %21 = vector.extract_strided_slice %20 {offsets = [0, 0], sizes = [8, 128], strides = [1, 1]} : vector<8x512xf32> to vector<8x128xf32>
    %22 = arith.negf %21 : vector<8x128xf32>
    %23 = math.exp %22 : vector<8x128xf32>
    %cst_18 = arith.constant 1.000000e+00 : f32
    %24 = vector.broadcast %cst_18 : f32 to vector<8x128xf32>
    %25 = arith.addf %24, %23 : vector<8x128xf32>
    %26 = arith.divf %24, %25 : vector<8x128xf32>
    %27 = vector.extract_strided_slice %20 {offsets = [0, 128], sizes = [8, 128], strides = [1, 1]} : vector<8x512xf32> to vector<8x128xf32>
    %28 = arith.negf %27 : vector<8x128xf32>
    %29 = math.exp %28 : vector<8x128xf32>
    %cst_19 = arith.constant 1.000000e+00 : f32
    %30 = vector.broadcast %cst_19 : f32 to vector<8x128xf32>
    %31 = arith.addf %30, %29 : vector<8x128xf32>
    %32 = arith.divf %30, %31 : vector<8x128xf32>
    %33 = vector.extract_strided_slice %20 {offsets = [0, 256], sizes = [8, 128], strides = [1, 1]} : vector<8x512xf32> to vector<8x128xf32>
    %34 = math.tanh %33 : vector<8x128xf32>
    %35 = vector.extract_strided_slice %20 {offsets = [0, 384], sizes = [8, 128], strides = [1, 1]} : vector<8x512xf32> to vector<8x128xf32>
    %36 = arith.negf %35 : vector<8x128xf32>
    %37 = math.exp %36 : vector<8x128xf32>
    %cst_20 = arith.constant 1.000000e+00 : f32
    %38 = vector.broadcast %cst_20 : f32 to vector<8x128xf32>
    %39 = arith.addf %38, %37 : vector<8x128xf32>
    %40 = arith.divf %38, %39 : vector<8x128xf32>
    %41 = arith.mulf %32, %13 : vector<8x128xf32>
    %42 = arith.mulf %26, %34 : vector<8x128xf32>
    %43 = arith.addf %41, %42 : vector<8x128xf32>
    %44 = math.tanh %43 : vector<8x128xf32>
    %45 = arith.mulf %40, %44 : vector<8x128xf32>
    %c1_i32 = arith.constant 1 : i32
    %c8_i32_21 = arith.constant 8 : i32
    %46 = arith.muli %c1_i32, %c8_i32_21 : i32
    %47 = tpu.assume_multiple %46, 8 : i32
    %48 = arith.index_cast %47 : i32 to index
    %c0_22 = arith.constant 0 : index
    %49 = vector.load %arg7[%48, %c0_22] : memref<64x512xf32, #tpu.memory_space<vmem>>, vector<8x512xf32>
    %50 = arith.truncf %45 : vector<8x128xf32> to vector<8x128xbf16>
    %cst_23 = arith.constant dense<0.000000e+00> : vector<8x512xf32>
    %51 = tpu.matmul %50, %11, %cst_23 {dimension_numbers = #tpu.dot_dimension_numbers<[1], [0], [0], [1], [0, 0, 1, 1], [], []>} : vector<8x128xbf16>, vector<128x512xbf16>, vector<8x512xf32> -> vector<8x512xf32>
    %52 = arith.addf %49, %51 : vector<8x512xf32>
    %53 = vector.extract_strided_slice %52 {offsets = [0, 0], sizes = [8, 128], strides = [1, 1]} : vector<8x512xf32> to vector<8x128xf32>
    %54 = arith.negf %53 : vector<8x128xf32>
    %55 = math.exp %54 : vector<8x128xf32>
    %cst_24 = arith.constant 1.000000e+00 : f32
    %56 = vector.broadcast %cst_24 : f32 to vector<8x128xf32>
    %57 = arith.addf %56, %55 : vector<8x128xf32>
    %58 = arith.divf %56, %57 : vector<8x128xf32>
    %59 = vector.extract_strided_slice %52 {offsets = [0, 128], sizes = [8, 128], strides = [1, 1]} : vector<8x512xf32> to vector<8x128xf32>
    %60 = arith.negf %59 : vector<8x128xf32>
    %61 = math.exp %60 : vector<8x128xf32>
    %cst_25 = arith.constant 1.000000e+00 : f32
    %62 = vector.broadcast %cst_25 : f32 to vector<8x128xf32>
    %63 = arith.addf %62, %61 : vector<8x128xf32>
    %64 = arith.divf %62, %63 : vector<8x128xf32>
    %65 = vector.extract_strided_slice %52 {offsets = [0, 256], sizes = [8, 128], strides = [1, 1]} : vector<8x512xf32> to vector<8x128xf32>
    %66 = math.tanh %65 : vector<8x128xf32>
    %67 = vector.extract_strided_slice %52 {offsets = [0, 384], sizes = [8, 128], strides = [1, 1]} : vector<8x512xf32> to vector<8x128xf32>
    %68 = arith.negf %67 : vector<8x128xf32>
    %69 = math.exp %68 : vector<8x128xf32>
    %cst_26 = arith.constant 1.000000e+00 : f32
    %70 = vector.broadcast %cst_26 : f32 to vector<8x128xf32>
    %71 = arith.addf %70, %69 : vector<8x128xf32>
    %72 = arith.divf %70, %71 : vector<8x128xf32>
    %73 = arith.mulf %64, %43 : vector<8x128xf32>
    %74 = arith.mulf %58, %66 : vector<8x128xf32>
    %75 = arith.addf %73, %74 : vector<8x128xf32>
    %76 = math.tanh %75 : vector<8x128xf32>
    %77 = arith.mulf %72, %76 : vector<8x128xf32>
    %c2_i32 = arith.constant 2 : i32
    %c8_i32_27 = arith.constant 8 : i32
    %78 = arith.muli %c2_i32, %c8_i32_27 : i32
    %79 = tpu.assume_multiple %78, 8 : i32
    %80 = arith.index_cast %79 : i32 to index
    %c0_28 = arith.constant 0 : index
    %81 = vector.load %arg7[%80, %c0_28] : memref<64x512xf32, #tpu.memory_space<vmem>>, vector<8x512xf32>
    %82 = arith.truncf %77 : vector<8x128xf32> to vector<8x128xbf16>
    %cst_29 = arith.constant dense<0.000000e+00> : vector<8x512xf32>
    %83 = tpu.matmul %82, %11, %cst_29 {dimension_numbers = #tpu.dot_dimension_numbers<[1], [0], [0], [1], [0, 0, 1, 1], [], []>} : vector<8x128xbf16>, vector<128x512xbf16>, vector<8x512xf32> -> vector<8x512xf32>
    %84 = arith.addf %81, %83 : vector<8x512xf32>
    %85 = vector.extract_strided_slice %84 {offsets = [0, 0], sizes = [8, 128], strides = [1, 1]} : vector<8x512xf32> to vector<8x128xf32>
    %86 = arith.negf %85 : vector<8x128xf32>
    %87 = math.exp %86 : vector<8x128xf32>
    %cst_30 = arith.constant 1.000000e+00 : f32
    %88 = vector.broadcast %cst_30 : f32 to vector<8x128xf32>
    %89 = arith.addf %88, %87 : vector<8x128xf32>
    %90 = arith.divf %88, %89 : vector<8x128xf32>
    %91 = vector.extract_strided_slice %84 {offsets = [0, 128], sizes = [8, 128], strides = [1, 1]} : vector<8x512xf32> to vector<8x128xf32>
    %92 = arith.negf %91 : vector<8x128xf32>
    %93 = math.exp %92 : vector<8x128xf32>
    %cst_31 = arith.constant 1.000000e+00 : f32
    %94 = vector.broadcast %cst_31 : f32 to vector<8x128xf32>
    %95 = arith.addf %94, %93 : vector<8x128xf32>
    %96 = arith.divf %94, %95 : vector<8x128xf32>
    %97 = vector.extract_strided_slice %84 {offsets = [0, 256], sizes = [8, 128], strides = [1, 1]} : vector<8x512xf32> to vector<8x128xf32>
    %98 = math.tanh %97 : vector<8x128xf32>
    %99 = vector.extract_strided_slice %84 {offsets = [0, 384], sizes = [8, 128], strides = [1, 1]} : vector<8x512xf32> to vector<8x128xf32>
    %100 = arith.negf %99 : vector<8x128xf32>
    %101 = math.exp %100 : vector<8x128xf32>
    %cst_32 = arith.constant 1.000000e+00 : f32
    %102 = vector.broadcast %cst_32 : f32 to vector<8x128xf32>
    %103 = arith.addf %102, %101 : vector<8x128xf32>
    %104 = arith.divf %102, %103 : vector<8x128xf32>
    %105 = arith.mulf %96, %75 : vector<8x128xf32>
    %106 = arith.mulf %90, %98 : vector<8x128xf32>
    %107 = arith.addf %105, %106 : vector<8x128xf32>
    %108 = math.tanh %107 : vector<8x128xf32>
    %109 = arith.mulf %104, %108 : vector<8x128xf32>
    %c3_i32 = arith.constant 3 : i32
    %c8_i32_33 = arith.constant 8 : i32
    %110 = arith.muli %c3_i32, %c8_i32_33 : i32
    %111 = tpu.assume_multiple %110, 8 : i32
    %112 = arith.index_cast %111 : i32 to index
    %c0_34 = arith.constant 0 : index
    %113 = vector.load %arg7[%112, %c0_34] : memref<64x512xf32, #tpu.memory_space<vmem>>, vector<8x512xf32>
    %114 = arith.truncf %109 : vector<8x128xf32> to vector<8x128xbf16>
    %cst_35 = arith.constant dense<0.000000e+00> : vector<8x512xf32>
    %115 = tpu.matmul %114, %11, %cst_35 {dimension_numbers = #tpu.dot_dimension_numbers<[1], [0], [0], [1], [0, 0, 1, 1], [], []>} : vector<8x128xbf16>, vector<128x512xbf16>, vector<8x512xf32> -> vector<8x512xf32>
    %116 = arith.addf %113, %115 : vector<8x512xf32>
    %117 = vector.extract_strided_slice %116 {offsets = [0, 0], sizes = [8, 128], strides = [1, 1]} : vector<8x512xf32> to vector<8x128xf32>
    %118 = arith.negf %117 : vector<8x128xf32>
    %119 = math.exp %118 : vector<8x128xf32>
    %cst_36 = arith.constant 1.000000e+00 : f32
    %120 = vector.broadcast %cst_36 : f32 to vector<8x128xf32>
    %121 = arith.addf %120, %119 : vector<8x128xf32>
    %122 = arith.divf %120, %121 : vector<8x128xf32>
    %123 = vector.extract_strided_slice %116 {offsets = [0, 128], sizes = [8, 128], strides = [1, 1]} : vector<8x512xf32> to vector<8x128xf32>
    %124 = arith.negf %123 : vector<8x128xf32>
    %125 = math.exp %124 : vector<8x128xf32>
    %cst_37 = arith.constant 1.000000e+00 : f32
    %126 = vector.broadcast %cst_37 : f32 to vector<8x128xf32>
    %127 = arith.addf %126, %125 : vector<8x128xf32>
    %128 = arith.divf %126, %127 : vector<8x128xf32>
    %129 = vector.extract_strided_slice %116 {offsets = [0, 256], sizes = [8, 128], strides = [1, 1]} : vector<8x512xf32> to vector<8x128xf32>
    %130 = math.tanh %129 : vector<8x128xf32>
    %131 = vector.extract_strided_slice %116 {offsets = [0, 384], sizes = [8, 128], strides = [1, 1]} : vector<8x512xf32> to vector<8x128xf32>
    %132 = arith.negf %131 : vector<8x128xf32>
    %133 = math.exp %132 : vector<8x128xf32>
    %cst_38 = arith.constant 1.000000e+00 : f32
    %134 = vector.broadcast %cst_38 : f32 to vector<8x128xf32>
    %135 = arith.addf %134, %133 : vector<8x128xf32>
    %136 = arith.divf %134, %135 : vector<8x128xf32>
    %137 = arith.mulf %128, %107 : vector<8x128xf32>
    %138 = arith.mulf %122, %130 : vector<8x128xf32>
    %139 = arith.addf %137, %138 : vector<8x128xf32>
    %140 = math.tanh %139 : vector<8x128xf32>
    %141 = arith.mulf %136, %140 : vector<8x128xf32>
    %c4_i32 = arith.constant 4 : i32
    %c8_i32_39 = arith.constant 8 : i32
    %142 = arith.muli %c4_i32, %c8_i32_39 : i32
    %143 = tpu.assume_multiple %142, 8 : i32
    %144 = arith.index_cast %143 : i32 to index
    %c0_40 = arith.constant 0 : index
    %145 = vector.load %arg7[%144, %c0_40] : memref<64x512xf32, #tpu.memory_space<vmem>>, vector<8x512xf32>
    %146 = arith.truncf %141 : vector<8x128xf32> to vector<8x128xbf16>
    %cst_41 = arith.constant dense<0.000000e+00> : vector<8x512xf32>
    %147 = tpu.matmul %146, %11, %cst_41 {dimension_numbers = #tpu.dot_dimension_numbers<[1], [0], [0], [1], [0, 0, 1, 1], [], []>} : vector<8x128xbf16>, vector<128x512xbf16>, vector<8x512xf32> -> vector<8x512xf32>
    %148 = arith.addf %145, %147 : vector<8x512xf32>
    %149 = vector.extract_strided_slice %148 {offsets = [0, 0], sizes = [8, 128], strides = [1, 1]} : vector<8x512xf32> to vector<8x128xf32>
    %150 = arith.negf %149 : vector<8x128xf32>
    %151 = math.exp %150 : vector<8x128xf32>
    %cst_42 = arith.constant 1.000000e+00 : f32
    %152 = vector.broadcast %cst_42 : f32 to vector<8x128xf32>
    %153 = arith.addf %152, %151 : vector<8x128xf32>
    %154 = arith.divf %152, %153 : vector<8x128xf32>
    %155 = vector.extract_strided_slice %148 {offsets = [0, 128], sizes = [8, 128], strides = [1, 1]} : vector<8x512xf32> to vector<8x128xf32>
    %156 = arith.negf %155 : vector<8x128xf32>
    %157 = math.exp %156 : vector<8x128xf32>
    %cst_43 = arith.constant 1.000000e+00 : f32
    %158 = vector.broadcast %cst_43 : f32 to vector<8x128xf32>
    %159 = arith.addf %158, %157 : vector<8x128xf32>
    %160 = arith.divf %158, %159 : vector<8x128xf32>
    %161 = vector.extract_strided_slice %148 {offsets = [0, 256], sizes = [8, 128], strides = [1, 1]} : vector<8x512xf32> to vector<8x128xf32>
    %162 = math.tanh %161 : vector<8x128xf32>
    %163 = vector.extract_strided_slice %148 {offsets = [0, 384], sizes = [8, 128], strides = [1, 1]} : vector<8x512xf32> to vector<8x128xf32>
    %164 = arith.negf %163 : vector<8x128xf32>
    %165 = math.exp %164 : vector<8x128xf32>
    %cst_44 = arith.constant 1.000000e+00 : f32
    %166 = vector.broadcast %cst_44 : f32 to vector<8x128xf32>
    %167 = arith.addf %166, %165 : vector<8x128xf32>
    %168 = arith.divf %166, %167 : vector<8x128xf32>
    %169 = arith.mulf %160, %139 : vector<8x128xf32>
    %170 = arith.mulf %154, %162 : vector<8x128xf32>
    %171 = arith.addf %169, %170 : vector<8x128xf32>
    %172 = math.tanh %171 : vector<8x128xf32>
    %173 = arith.mulf %168, %172 : vector<8x128xf32>
    %c5_i32 = arith.constant 5 : i32
    %c8_i32_45 = arith.constant 8 : i32
    %174 = arith.muli %c5_i32, %c8_i32_45 : i32
    %175 = tpu.assume_multiple %174, 8 : i32
    %176 = arith.index_cast %175 : i32 to index
    %c0_46 = arith.constant 0 : index
    %177 = vector.load %arg7[%176, %c0_46] : memref<64x512xf32, #tpu.memory_space<vmem>>, vector<8x512xf32>
    %178 = arith.truncf %173 : vector<8x128xf32> to vector<8x128xbf16>
    %cst_47 = arith.constant dense<0.000000e+00> : vector<8x512xf32>
    %179 = tpu.matmul %178, %11, %cst_47 {dimension_numbers = #tpu.dot_dimension_numbers<[1], [0], [0], [1], [0, 0, 1, 1], [], []>} : vector<8x128xbf16>, vector<128x512xbf16>, vector<8x512xf32> -> vector<8x512xf32>
    %180 = arith.addf %177, %179 : vector<8x512xf32>
    %181 = vector.extract_strided_slice %180 {offsets = [0, 0], sizes = [8, 128], strides = [1, 1]} : vector<8x512xf32> to vector<8x128xf32>
    %182 = arith.negf %181 : vector<8x128xf32>
    %183 = math.exp %182 : vector<8x128xf32>
    %cst_48 = arith.constant 1.000000e+00 : f32
    %184 = vector.broadcast %cst_48 : f32 to vector<8x128xf32>
    %185 = arith.addf %184, %183 : vector<8x128xf32>
    %186 = arith.divf %184, %185 : vector<8x128xf32>
    %187 = vector.extract_strided_slice %180 {offsets = [0, 128], sizes = [8, 128], strides = [1, 1]} : vector<8x512xf32> to vector<8x128xf32>
    %188 = arith.negf %187 : vector<8x128xf32>
    %189 = math.exp %188 : vector<8x128xf32>
    %cst_49 = arith.constant 1.000000e+00 : f32
    %190 = vector.broadcast %cst_49 : f32 to vector<8x128xf32>
    %191 = arith.addf %190, %189 : vector<8x128xf32>
    %192 = arith.divf %190, %191 : vector<8x128xf32>
    %193 = vector.extract_strided_slice %180 {offsets = [0, 256], sizes = [8, 128], strides = [1, 1]} : vector<8x512xf32> to vector<8x128xf32>
    %194 = math.tanh %193 : vector<8x128xf32>
    %195 = vector.extract_strided_slice %180 {offsets = [0, 384], sizes = [8, 128], strides = [1, 1]} : vector<8x512xf32> to vector<8x128xf32>
    %196 = arith.negf %195 : vector<8x128xf32>
    %197 = math.exp %196 : vector<8x128xf32>
    %cst_50 = arith.constant 1.000000e+00 : f32
    %198 = vector.broadcast %cst_50 : f32 to vector<8x128xf32>
    %199 = arith.addf %198, %197 : vector<8x128xf32>
    %200 = arith.divf %198, %199 : vector<8x128xf32>
    %201 = arith.mulf %192, %171 : vector<8x128xf32>
    %202 = arith.mulf %186, %194 : vector<8x128xf32>
    %203 = arith.addf %201, %202 : vector<8x128xf32>
    %204 = math.tanh %203 : vector<8x128xf32>
    %205 = arith.mulf %200, %204 : vector<8x128xf32>
    %c6_i32 = arith.constant 6 : i32
    %c8_i32_51 = arith.constant 8 : i32
    %206 = arith.muli %c6_i32, %c8_i32_51 : i32
    %207 = tpu.assume_multiple %206, 8 : i32
    %208 = arith.index_cast %207 : i32 to index
    %c0_52 = arith.constant 0 : index
    %209 = vector.load %arg7[%208, %c0_52] : memref<64x512xf32, #tpu.memory_space<vmem>>, vector<8x512xf32>
    %210 = arith.truncf %205 : vector<8x128xf32> to vector<8x128xbf16>
    %cst_53 = arith.constant dense<0.000000e+00> : vector<8x512xf32>
    %211 = tpu.matmul %210, %11, %cst_53 {dimension_numbers = #tpu.dot_dimension_numbers<[1], [0], [0], [1], [0, 0, 1, 1], [], []>} : vector<8x128xbf16>, vector<128x512xbf16>, vector<8x512xf32> -> vector<8x512xf32>
    %212 = arith.addf %209, %211 : vector<8x512xf32>
    %213 = vector.extract_strided_slice %212 {offsets = [0, 0], sizes = [8, 128], strides = [1, 1]} : vector<8x512xf32> to vector<8x128xf32>
    %214 = arith.negf %213 : vector<8x128xf32>
    %215 = math.exp %214 : vector<8x128xf32>
    %cst_54 = arith.constant 1.000000e+00 : f32
    %216 = vector.broadcast %cst_54 : f32 to vector<8x128xf32>
    %217 = arith.addf %216, %215 : vector<8x128xf32>
    %218 = arith.divf %216, %217 : vector<8x128xf32>
    %219 = vector.extract_strided_slice %212 {offsets = [0, 128], sizes = [8, 128], strides = [1, 1]} : vector<8x512xf32> to vector<8x128xf32>
    %220 = arith.negf %219 : vector<8x128xf32>
    %221 = math.exp %220 : vector<8x128xf32>
    %cst_55 = arith.constant 1.000000e+00 : f32
    %222 = vector.broadcast %cst_55 : f32 to vector<8x128xf32>
    %223 = arith.addf %222, %221 : vector<8x128xf32>
    %224 = arith.divf %222, %223 : vector<8x128xf32>
    %225 = vector.extract_strided_slice %212 {offsets = [0, 256], sizes = [8, 128], strides = [1, 1]} : vector<8x512xf32> to vector<8x128xf32>
    %226 = math.tanh %225 : vector<8x128xf32>
    %227 = vector.extract_strided_slice %212 {offsets = [0, 384], sizes = [8, 128], strides = [1, 1]} : vector<8x512xf32> to vector<8x128xf32>
    %228 = arith.negf %227 : vector<8x128xf32>
    %229 = math.exp %228 : vector<8x128xf32>
    %cst_56 = arith.constant 1.000000e+00 : f32
    %230 = vector.broadcast %cst_56 : f32 to vector<8x128xf32>
    %231 = arith.addf %230, %229 : vector<8x128xf32>
    %232 = arith.divf %230, %231 : vector<8x128xf32>
    %233 = arith.mulf %224, %203 : vector<8x128xf32>
    %234 = arith.mulf %218, %226 : vector<8x128xf32>
    %235 = arith.addf %233, %234 : vector<8x128xf32>
    %236 = math.tanh %235 : vector<8x128xf32>
    %237 = arith.mulf %232, %236 : vector<8x128xf32>
    %c7_i32 = arith.constant 7 : i32
    %c8_i32_57 = arith.constant 8 : i32
    %238 = arith.muli %c7_i32, %c8_i32_57 : i32
    %239 = tpu.assume_multiple %238, 8 : i32
    %240 = arith.index_cast %239 : i32 to index
    %c0_58 = arith.constant 0 : index
    %241 = vector.load %arg7[%240, %c0_58] : memref<64x512xf32, #tpu.memory_space<vmem>>, vector<8x512xf32>
    %242 = arith.truncf %237 : vector<8x128xf32> to vector<8x128xbf16>
    %cst_59 = arith.constant dense<0.000000e+00> : vector<8x512xf32>
    %243 = tpu.matmul %242, %11, %cst_59 {dimension_numbers = #tpu.dot_dimension_numbers<[1], [0], [0], [1], [0, 0, 1, 1], [], []>} : vector<8x128xbf16>, vector<128x512xbf16>, vector<8x512xf32> -> vector<8x512xf32>
    %244 = arith.addf %241, %243 : vector<8x512xf32>
    %245 = vector.extract_strided_slice %244 {offsets = [0, 0], sizes = [8, 128], strides = [1, 1]} : vector<8x512xf32> to vector<8x128xf32>
    %246 = arith.negf %245 : vector<8x128xf32>
    %247 = math.exp %246 : vector<8x128xf32>
    %cst_60 = arith.constant 1.000000e+00 : f32
    %248 = vector.broadcast %cst_60 : f32 to vector<8x128xf32>
    %249 = arith.addf %248, %247 : vector<8x128xf32>
    %250 = arith.divf %248, %249 : vector<8x128xf32>
    %251 = vector.extract_strided_slice %244 {offsets = [0, 128], sizes = [8, 128], strides = [1, 1]} : vector<8x512xf32> to vector<8x128xf32>
    %252 = arith.negf %251 : vector<8x128xf32>
    %253 = math.exp %252 : vector<8x128xf32>
    %cst_61 = arith.constant 1.000000e+00 : f32
    %254 = vector.broadcast %cst_61 : f32 to vector<8x128xf32>
    %255 = arith.addf %254, %253 : vector<8x128xf32>
    %256 = arith.divf %254, %255 : vector<8x128xf32>
    %257 = vector.extract_strided_slice %244 {offsets = [0, 256], sizes = [8, 128], strides = [1, 1]} : vector<8x512xf32> to vector<8x128xf32>
    %258 = math.tanh %257 : vector<8x128xf32>
    %259 = vector.extract_strided_slice %244 {offsets = [0, 384], sizes = [8, 128], strides = [1, 1]} : vector<8x512xf32> to vector<8x128xf32>
    %260 = arith.negf %259 : vector<8x128xf32>
    %261 = math.exp %260 : vector<8x128xf32>
    %cst_62 = arith.constant 1.000000e+00 : f32
    %262 = vector.broadcast %cst_62 : f32 to vector<8x128xf32>
    %263 = arith.addf %262, %261 : vector<8x128xf32>
    %264 = arith.divf %262, %263 : vector<8x128xf32>
    %265 = arith.mulf %256, %235 : vector<8x128xf32>
    %266 = arith.mulf %250, %258 : vector<8x128xf32>
    %267 = arith.addf %265, %266 : vector<8x128xf32>
    %268 = math.tanh %267 : vector<8x128xf32>
    %269 = arith.mulf %264, %268 : vector<8x128xf32>
    %c8_i32_63 = arith.constant 8 : i32
    %c0_64 = arith.constant 0 : index
    %c0_65 = arith.constant 0 : index
    %270 = vector.load %arg8[%c0_64, %c0_65] : memref<8x128xf32, #tpu.memory_space<vmem>>, vector<8x128xf32>
    tpu.vector_store %arg8[%c0_64, %c0_65], %269 {strides = array<i32>} : memref<8x128xf32, #tpu.memory_space<vmem>>, vector<8x128xf32>,
    %c0_66 = arith.constant 0 : index
    %c0_67 = arith.constant 0 : index
    %271 = vector.load %arg9[%c0_66, %c0_67] : memref<8x128xf32, #tpu.memory_space<vmem>>, vector<8x128xf32>
    tpu.vector_store %arg9[%c0_66, %c0_67], %267 {strides = array<i32>} : memref<8x128xf32, #tpu.memory_space<vmem>>, vector<8x128xf32>,
    %c0_i32_68 = arith.constant 0 : i32
    %272 = arith.cmpi eq, %arg1, %c0_i32_68 : i32
    %273 = arith.extui %272 : i1 to i32
    %c0_i32_69 = arith.constant 0 : i32
    %274 = arith.cmpi ne, %273, %c0_i32_69 : i32
    scf.if %274 {
      %c0_70 = arith.constant 0 : index
      %c0_71 = arith.constant 0 : index
      %275 = vector.load %arg6[%c0_70, %c0_71] : memref<8x128xf32, #tpu.memory_space<vmem>>, vector<8x128xf32>
      tpu.vector_store %arg6[%c0_70, %c0_71], %269 {strides = array<i32>} : memref<8x128xf32, #tpu.memory_space<vmem>>, vector<8x128xf32>,
    } else {
    }
    return
  }
  func.func @transform_0(%arg0: i32, %arg1: i32) -> (i32, i32, i32) {
    %c0_i32 = arith.constant 0 : i32
    %c0_i32_0 = arith.constant 0 : i32
    return %arg0, %arg1, %c0_i32 : i32, i32, i32
  }
  func.func @transform_1(%arg0: i32, %arg1: i32) -> (i32, i32) {
    %c0_i32 = arith.constant 0 : i32
    %c0_i32_0 = arith.constant 0 : i32
    %c0_i32_1 = arith.constant 0 : i32
    return %c0_i32, %c0_i32_0 : i32, i32
  }
  func.func @transform_2(%arg0: i32, %arg1: i32) -> (i32, i32) {
    %c0_i32 = arith.constant 0 : i32
    %c0_i32_0 = arith.constant 0 : i32
    %c0_i32_1 = arith.constant 0 : i32
    return %c0_i32, %c0_i32_0 : i32, i32
  }
  func.func @transform_3(%arg0: i32, %arg1: i32) -> (i32, i32) {
    %c0_i32 = arith.constant 0 : i32
    %c0_i32_0 = arith.constant 0 : i32
    %c0_i32_1 = arith.constant 0 : i32
    return %c0_i32, %c0_i32_0 : i32, i32
  }
  func.func @transform_4(%arg0: i32, %arg1: i32) -> (i32, i32) {
    %c0_i32 = arith.constant 0 : i32
    %c0_i32_0 = arith.constant 0 : i32
    return %arg0, %c0_i32 : i32, i32
  }
}

</mosaic_0001>

<bundles_post_ra>
// kernel: tpu_custom_call.1
= control target key start
LH: loop header
LB: loop body
LE: loop exit
PB: predicated region body
PF: predicated region fallthrough
CT: control target
= control target key end

     0   :  { %9 = vsyncpa [#allocation6], 0  ;;  %s2546_s0 = inlined_call_operand.vmem [shape: bf16[1,64,32], index: 0, kind: input, shape index: {}]   ;;  %s2547_s1 = inlined_call_operand.hbm [shape: bf16[32,512], index: 1, kind: input, shape index: {}]   ;;  %s2548_s2 = inlined_call_operand.hbm [shape: bf16[128,512], index: 2, kind: input, shape index: {}]   ;;  %s2549_s3 = inlined_call_operand.vmem [shape: f32[1,512], index: 3, kind: input, shape index: {}]   ;;  %s2550_s4 = inlined_call_operand.hbm [shape: f32[8,128], index: 4, kind: output, shape index: {}]  }
   0x1   :  { %10 = vsyncpa [#allocation9], 0 }
   0x2   :  { %11 = vsyncpa [#allocation7], 0  ;;  %s18_s17 = sshll.u32 %s2547_s1, 4  ;;  %s2017_s18 = smov [#allocation5]   ;;  %s19_s17 = int_to_ptr.hbm [resolvable:$true] %s18_s17 }
   0x3   :  { %s20_s19 = sshll.u32 %s2017_s18, 4  ;;  %s31_s22 = sshll.u32 %s2548_s2, 4  ;;  %s21_s19 = int_to_ptr.vmem [resolvable:$true] %s20_s19  ;;  %s32_s22 = int_to_ptr.hbm [resolvable:$true] %s31_s22 }
   0x4   :  { %s2018_s23 = smov 256   ;;  %s2019_s24 = smov 16  }
   0x5   :  { %26 = dma.hbm_to_vmem [thread:$0]  %s19_s17, 1024, %s21_s19, [#allocation6], %s2018_s23, %s2018_s23, %s2019_s24  }
   0x6   :  { %s2020_s25 = smov [#allocation8]  }
   0x7   :  { %s33_s26 = sshll.u32 %s2020_s25, 4  ;;  %s34_s26 = int_to_ptr.vmem [resolvable:$true] %s33_s26 }
   0x8   :  { %39 = dma.hbm_to_vmem [thread:$0]  %s32_s22, 4096, %s34_s26, [#allocation9], %s2018_s23, %s2018_s23, %s2019_s24  }
   0x9   :  { %2011 = dma.done.wait [#allocation6], 1024  }
   0xa   :  { %2012 = vsyncadd [#allocation6], 4294966272 }
   0xb   :  { %2013 = dma.done.wait [#allocation9], 4096  }
   0xc   :  { %2014 = vsyncadd [#allocation9], 4294963200  ;;  %v1579_v0 = vld [vmem:[#allocation5 + $0x20] sm:$0xf]  ;;  %v1771_v1 = vld [vmem:[#allocation5 + $0x2c] sm:$0xf0] }
   0xd   :  { %v1769_v2 = vld [vmem:[#allocation5 + $0x24] sm:$0xf]  ;;  %v1580_v3 = vor.u32 %v1771_v1, %v1579_v0  ;;  %v1581_v4 = vld [vmem:[#allocation5 + $0x30] sm:$0xf0]  ;;  %v1587_v5 = vld [vmem:[#allocation5 + $0x28] sm:$0xf] }
   0xe   :  { %v1772_v6 = vld [vmem:[#allocation5 + $0x34] sm:$0xf0]  ;;  %v1584_v7 = vor.u32 %v1769_v2, %v1581_v4  ;;  %v1770_v9 = vld [vmem:[#allocation5 + $0x2c] sm:$0xf]  ;;  %v1589_v10 = vld [vmem:[#allocation5 + $0x38] sm:$0xf0] }
   0xf   :  { %v1588_v8 = vor.u32 %v1772_v6, %v1587_v5  ;;  %v1563_v11 = vld [vmem:[#allocation5] sm:$0xf]  ;;  %162 = vmatpush.bf16.msra.mxu0 %v1580_v3  ;;  %v1592_v12 = vor.u32 %v1770_v9, %v1589_v10  ;;  %v1767_v13 = vld [vmem:[#allocation5 + $0xc] sm:$0xf0]  ;;  %v1765_v14 = vld [vmem:[#allocation5 + $0x4] sm:$0xf] }
  0x10   :  { %v1565_v15 = vld [vmem:[#allocation5 + $0x10] sm:$0xf0]  ;;  %191 = vmatpush.bf16.msra.mxu1 %v1584_v7  ;;  %v1564_v16 = vor.u32 %v1767_v13, %v1563_v11  ;;  %v1571_v18 = vld [vmem:[#allocation5 + $0x8] sm:$0xf]  ;;  %v1768_v19 = vld [vmem:[#allocation5 + $0x14] sm:$0xf0] }
  0x11   :  { %220 = vmatpush.bf16.msra.mxu2 %v1588_v8  ;;  %v1568_v17 = vor.u32 %v1765_v14, %v1565_v15  ;;  %v1766_v20 = vld [vmem:[#allocation5 + $0xc] sm:$0xf]  ;;  %249 = vmatpush.bf16.msra.mxu3 %v1592_v12  ;;  %v1572_v21 = vor.u32 %v1768_v19, %v1571_v18  ;;  %v1573_v22 = vld [vmem:[#allocation5 + $0x18] sm:$0xf0]  ;;  %v1761_v23 = vld [vmem:[%s2546_s0] sm:$0xff]  ;;  %vm143_vm0 = vcmask 261120  }
  0x12   :  { %v1723_v24 = vld [vmem:[#allocation8 + $0xe0] sm:$0xf]  ;;  %v1576_v25 = vor.u32 %v1766_v20, %v1573_v22  ;;  %v1803_v26 = vld [vmem:[#allocation8 + $0xec] sm:$0xf0]  ;;  %v1801_v27 = vld [vmem:[#allocation8 + $0xe4] sm:$0xf] }
  0x13   :  { %v1725_v28 = vld [vmem:[#allocation8 + $0xf0] sm:$0xf0]  ;;  %163 = vmatpush.bf16.msra.mxu0 %v1564_v16  ;;  %v2057_v29 = vor.u32 %v1803_v26, %v1723_v24  ;;  %v1802_v31 = vld [vmem:[#allocation8 + $0xec] sm:$0xf]  ;;  %v1733_v32 = vld [vmem:[#allocation8 + $0xf8] sm:$0xf0] }
  0x14   :  { %v2059_v30 = vor.u32 %v1801_v27, %v1725_v28  ;;  %v1707_v33 = vld [vmem:[#allocation8 + $0xc0] sm:$0xf]  ;;  %192 = vmatpush.bf16.msra.mxu1 %v1568_v17  ;;  %v1799_v34 = vld [vmem:[#allocation8 + $0xcc] sm:$0xf0]  ;;  %v1797_v35 = vld [vmem:[#allocation8 + $0xc4] sm:$0xf]  ;;  %v2062_v37 = vor.u32 %v1802_v31, %v1733_v32 }
  0x15   :  { %221 = vmatpush.bf16.msra.mxu2 %v1572_v21  ;;  %v1709_v36 = vld [vmem:[#allocation8 + $0xd0] sm:$0xf0]  ;;  %250 = vmatpush.bf16.msra.mxu3 %v1576_v25  ;;  %v2064_v38 = vor.u32 %v1799_v34, %v1707_v33  ;;  %v1798_v39 = vld [vmem:[#allocation8 + $0xcc] sm:$0xf]  ;;  %v1731_v40 = vld [vmem:[#allocation8 + $0xe8] sm:$0xf] }
  0x16   :  { %1593 = vmatmul.msk.bf16.vlgmr.msra.gmra.mxu0 %vm143_vm0, %v1761_v23  ;;  %v2068_v41 = vor.u32 %v1797_v35, %v1709_v36  ;;  %v1717_v42 = vld [vmem:[#allocation8 + $0xd8] sm:$0xf0]  ;;  %v1804_v43 = vld [vmem:[#allocation8 + $0xf4] sm:$0xf0]  ;;  %v1691_v44 = vld [vmem:[#allocation8 + $0xa0] sm:$0xf] }
  0x17   :  { %506 = vmatpush.bf16.msrb.mxu0 %v2057_v29  ;;  %1597 = vmatmul.msk.bf16.vlgmr.msra.gmra.mxu1 %vm143_vm0, %v1761_v23  ;;  %v2072_v45 = vor.u32 %v1804_v43, %v1731_v40  ;;  %v1795_v46 = vld [vmem:[#allocation8 + $0xac] sm:$0xf0]  ;;  %v1793_v47 = vld [vmem:[#allocation8 + $0xa4] sm:$0xf]  ;;  %v1693_v48 = vld [vmem:[#allocation8 + $0xb0] sm:$0xf0]  ;;  %v2077_v50 = vor.u32 %v1798_v39, %v1717_v42 }
  0x18   :  { %519 = vmatpush.bf16.msrb.mxu1 %v2059_v30  ;;  %1601 = vmatmul.msk.bf16.vlgmr.msra.gmra.mxu2 %vm143_vm0, %v1761_v23  ;;  %v1715_v49 = vld [vmem:[#allocation8 + $0xc8] sm:$0xf]  ;;  %v2079_v51 = vor.u32 %v1795_v46, %v1691_v44  ;;  %v1794_v52 = vld [vmem:[#allocation8 + $0xac] sm:$0xf]  ;;  %v1701_v53 = vld [vmem:[#allocation8 + $0xb8] sm:$0xf0]  ;;  %v2083_v55 = vor.u32 %v1793_v47, %v1693_v48 }
  0x19   :  { %1605 = vmatmul.msk.bf16.vlgmr.msra.gmra.mxu3 %vm143_vm0, %v1761_v23  ;;  %v1800_v54 = vld [vmem:[#allocation8 + $0xd4] sm:$0xf0]  ;;  %532 = vmatpush.bf16.msrb.mxu2 %v2072_v45  ;;  %v1675_v57 = vld [vmem:[#allocation8 + $0x80] sm:$0xf]  ;;  %v1791_v58 = vld [vmem:[#allocation8 + $0x8c] sm:$0xf0]  ;;  %v2089_v63 = vor.u32 %v1794_v52, %v1701_v53 }
  0x1a   :  { %545 = vmatpush.bf16.msrb.mxu3 %v2062_v37  ;;  %v2085_v56 = vor.u32 %v1800_v54, %v1715_v49  ;;  %v1789_v59 = vld [vmem:[#allocation8 + $0x84] sm:$0xf]  ;;  %v1677_v60 = vld [vmem:[#allocation8 + $0x90] sm:$0xf0]  ;;  %v1699_v61 = vld [vmem:[#allocation8 + $0xa8] sm:$0xf]  ;;  %v2091_v0 = vor.u32 %v1791_v58, %v1675_v57 }
  0x1b   :  { %507 = vmatpush.bf16.msrb.mxu0 %v2064_v38  ;;  %v1796_v62 = vld [vmem:[#allocation8 + $0xb4] sm:$0xf0]  ;;  %v1790_v1 = vld [vmem:[#allocation8 + $0x8c] sm:$0xf]  ;;  %v2095_v2 = vor.u32 %v1789_v59, %v1677_v60  ;;  %v1685_v3 = vld [vmem:[#allocation8 + $0x98] sm:$0xf0] }
  0x1c   :  { %520 = vmatpush.bf16.msrb.mxu1 %v2068_v41  ;;  %v2097_v4 = vor.u32 %v1796_v62, %v1699_v61  ;;  %v1659_v5 = vld [vmem:[#allocation8 + $0x60] sm:$0xf]  ;;  %v1787_v6 = vld [vmem:[#allocation8 + $0x6c] sm:$0xf0]  ;;  %v1785_v7 = vld [vmem:[#allocation8 + $0x64] sm:$0xf]  ;;  %v2104_v10 = vor.u32 %v1790_v1, %v1685_v3 }
  0x1d   :  { %533 = vmatpush.bf16.msrb.mxu2 %v2085_v56  ;;  %v1661_v8 = vld [vmem:[#allocation8 + $0x70] sm:$0xf0]  ;;  %v1762_v9 = vld [vmem:[%s2546_s0 + $0x8] sm:$0xff]  ;;  %v2106_v11 = vor.u32 %v1787_v6, %v1659_v5  ;;  %v1792_v14 = vld [vmem:[#allocation8 + $0x94] sm:$0xf0]  ;;  %s1527_s11 = sshll.u32 %s2550_s4, 4  ;;  %s1528_s11 = int_to_ptr.hbm [resolvable:$true] %s1527_s11 }
  0x1e   :  { %546 = vmatpush.bf16.msrb.mxu3 %v2077_v50  ;;  %v1786_v12 = vld [vmem:[#allocation8 + $0x6c] sm:$0xf]  ;;  %v1683_v13 = vld [vmem:[#allocation8 + $0x88] sm:$0xf]  ;;  %v2110_v15 = vor.u32 %v1785_v7, %v1661_v8  ;;  %v1669_v16 = vld [vmem:[#allocation8 + $0x78] sm:$0xf0] }
  0x1f   :  { %508 = vmatpush.bf16.msrb.mxu0 %v2079_v51  ;;  %v1643_v17 = vld [vmem:[#allocation8 + $0x40] sm:$0xf]  ;;  %v1783_v18 = vld [vmem:[#allocation8 + $0x4c] sm:$0xf0]  ;;  %v1781_v19 = vld [vmem:[#allocation8 + $0x44] sm:$0xf]  ;;  %v2112_v21 = vor.u32 %v1792_v14, %v1683_v13  ;;  %v2116_v22 = vor.u32 %v1786_v12, %v1669_v16 }
  0x20   :  { %521 = vmatpush.bf16.msrb.mxu1 %v2083_v55  ;;  %v1645_v20 = vld [vmem:[#allocation8 + $0x50] sm:$0xf0]  ;;  %v2118_v23 = vor.u32 %v1783_v18, %v1643_v17  ;;  %v1667_v24 = vld [vmem:[#allocation8 + $0x68] sm:$0xf]  ;;  %v1788_v25 = vld [vmem:[#allocation8 + $0x74] sm:$0xf0] }
  0x21   :  { %534 = vmatpush.bf16.msrb.mxu2 %v2097_v4  ;;  %v2122_v26 = vor.u32 %v1781_v19, %v1645_v20  ;;  %v1782_v27 = vld [vmem:[#allocation8 + $0x4c] sm:$0xf]  ;;  %v1653_v28 = vld [vmem:[#allocation8 + $0x58] sm:$0xf0]  ;;  %v2128_v31 = vor.u32 %v1788_v25, %v1667_v24  ;;  %v1627_v32 = vld [vmem:[#allocation8 + $0x20] sm:$0xf] }
  0x22   :  { %547 = vmatpush.bf16.msrb.mxu3 %v2089_v63  ;;  %v1779_v33 = vld [vmem:[#allocation8 + $0x2c] sm:$0xf0]  ;;  %v1777_v34 = vld [vmem:[#allocation8 + $0x24] sm:$0xf]  ;;  %v2132_v35 = vor.u32 %v1782_v27, %v1653_v28  ;;  %v1629_v39 = vld [vmem:[#allocation8 + $0x30] sm:$0xf0] }
  0x23   :  { %509 = vmatpush.bf16.msrb.mxu0 %v2091_v0  ;;  %v2134_v36 = vor.u32 %v1779_v33, %v1627_v32  ;;  %v1651_v40 = vld [vmem:[#allocation8 + $0x48] sm:$0xf]  ;;  %v1784_v42 = vld [vmem:[#allocation8 + $0x54] sm:$0xf0]  ;;  %v2137_v43 = vor.u32 %v1777_v34, %v1629_v39  ;;  %v1778_v44 = vld [vmem:[#allocation8 + $0x2c] sm:$0xf] }
  0x24   :  { %522 = vmatpush.bf16.msrb.mxu1 %v2095_v2  ;;  %v1637_v46 = vld [vmem:[#allocation8 + $0x38] sm:$0xf0]  ;;  %v1611_v47 = vld [vmem:[#allocation8] sm:$0xf]  ;;  %v1775_v48 = vld [vmem:[#allocation8 + $0xc] sm:$0xf0]  ;;  %v2140_v53 = vor.u32 %v1784_v42, %v1651_v40 }
  0x25   :  { %535 = vmatpush.bf16.msrb.mxu2 %v2112_v21  ;;  %v1773_v49 = vld [vmem:[#allocation8 + $0x4] sm:$0xf]  ;;  %v1613_v52 = vld [vmem:[#allocation8 + $0x10] sm:$0xf0]  ;;  %v2144_v54 = vor.u32 %v1778_v44, %v1637_v46  ;;  %v2146_v57 = vor.u32 %v1775_v48, %v1611_v47  ;;  %v1635_v58 = vld [vmem:[#allocation8 + $0x28] sm:$0xf] }
  0x26   :  { %548 = vmatpush.bf16.msrb.mxu3 %v2104_v10  ;;  %1594 = vmatmul.msk.bf16.gmra.mxu0 %vm143_vm0, %v1762_v9  ;;  %v1780_v59 = vld [vmem:[#allocation8 + $0x34] sm:$0xf0]  ;;  %v2149_v60 = vor.u32 %v1773_v49, %v1613_v52  ;;  %v1774_v61 = vld [vmem:[#allocation8 + $0xc] sm:$0xf]  ;;  %v1621_v62 = vld [vmem:[#allocation8 + $0x18] sm:$0xf0] }
  0x27   :  { %510 = vmatpush.bf16.msrb.mxu0 %v2106_v11  ;;  %1598 = vmatmul.msk.bf16.gmra.mxu1 %vm143_vm0, %v1762_v9  ;;  %v2152_v1 = vor.u32 %v1780_v59, %v1635_v58  ;;  %v1619_v3 = vld [vmem:[#allocation8 + $0x8] sm:$0xf]  ;;  %v1776_v5 = vld [vmem:[#allocation8 + $0x14] sm:$0xf0]  ;;  %v2156_v6 = vor.u32 %v1774_v61, %v1621_v62  ;;  %v1763_v7 = vld [vmem:[%s2546_s0 + $0x10] sm:$0xff]  ;;  %v2021_v12 = vmov 0.0|0.0  }
  0x28   :  { %523 = vmatpush.bf16.msrb.mxu1 %v2110_v15  ;;  %1602 = vmatmul.msk.bf16.gmra.mxu2 %vm143_vm0, %v1762_v9  ;;  %v2165_v8 = vor.u32 %v1776_v5, %v1619_v3  ;;  %v73_v16 = vld [vmem:[%s2549_s3] sm:$0xf]  ;;  %s2022_s3 = smov [#allocation10]  }
  0x29   :  { %1606 = vmatmul.msk.bf16.gmra.mxu3 %vm143_vm0, %v1762_v9  ;;  %536 = vmatpush.bf16.msrb.mxu2 %v2128_v31  ;;  %v1764_v9 = vld [vmem:[%s2546_s0 + $0x18] sm:$0xff]  ;;  %v75_v17 = vperm.slane %v73_v16, 0  ;;  %v76_v19 = vperm.slane %v73_v16, 1  ;;  %v2253_v32 = vperm.slane %v73_v16, 2  ;;  %v2255_v33 = vperm.slane %v73_v16, 3  ;;  %s1525_s8 = sshll.u32 %s2022_s3, 4  ;;  %s1526_s8 = int_to_ptr.vmem [resolvable:$true] %s1525_s8 }
  0x2a   :  { %549 = vmatpush.bf16.msrb.mxu3 %v2116_v22 }
  0x2b   :  { %511 = vmatpush.bf16.msrb.mxu0 %v2118_v23 }
  0x2c   :  { %524 = vmatpush.bf16.msrb.mxu1 %v2122_v26 }
  0x2d   :  { %537 = vmatpush.bf16.msrb.mxu2 %v2140_v53 }
  0x2e   :  { %550 = vmatpush.bf16.msrb.mxu3 %v2132_v35 }
  0x2f   :  { %512 = vmatpush.bf16.msrb.mxu0 %v2134_v36 }
  0x30   :  { %525 = vmatpush.bf16.msrb.mxu1 %v2137_v43 }
  0x31   :  { %538 = vmatpush.bf16.msrb.mxu2 %v2152_v1 }
  0x32   :  { %551 = vmatpush.bf16.msrb.mxu3 %v2144_v54 }
  0x33   :  { %513 = vmatpush.bf16.msrb.mxu0 %v2146_v57 }
  0x34   :  { %526 = vmatpush.bf16.msrb.mxu1 %v2149_v60 }
  0x35   :  { %539 = vmatpush.bf16.msrb.mxu2 %v2165_v8 }
  0x36   :  { %552 = vmatpush.bf16.msrb.mxu3 %v2156_v6  ;;  %1595 = vmatmul.msk.bf16.gmra.mxu0 %vm143_vm0, %v1763_v7 }
  0x37   :  { %633 = vmatpush.bf16.msra.mxu0 %v2057_v29  ;;  %1599 = vmatmul.msk.bf16.gmra.mxu1 %vm143_vm0, %v1763_v7 }
  0x38   :  { %646 = vmatpush.bf16.msra.mxu1 %v2059_v30  ;;  %1603 = vmatmul.msk.bf16.gmra.mxu2 %vm143_vm0, %v1763_v7 }
  0x39   :  { %1607 = vmatmul.msk.bf16.gmra.mxu3 %vm143_vm0, %v1763_v7  ;;  %659 = vmatpush.bf16.msra.mxu2 %v2072_v45 }
  0x3a   :  { %672 = vmatpush.bf16.msra.mxu3 %v2062_v37 }
  0x3b   :  { %634 = vmatpush.bf16.msra.mxu0 %v2064_v38 }
  0x3c   :  { %647 = vmatpush.bf16.msra.mxu1 %v2068_v41 }
  0x3d   :  { %660 = vmatpush.bf16.msra.mxu2 %v2085_v56 }
  0x3e   :  { %673 = vmatpush.bf16.msra.mxu3 %v2077_v50 }
  0x3f   :  { %635 = vmatpush.bf16.msra.mxu0 %v2079_v51 }
  0x40   :  { %648 = vmatpush.bf16.msra.mxu1 %v2083_v55 }
  0x41   :  { %661 = vmatpush.bf16.msra.mxu2 %v2097_v4 }
  0x42   :  { %674 = vmatpush.bf16.msra.mxu3 %v2089_v63 }
  0x43   :  { %636 = vmatpush.bf16.msra.mxu0 %v2091_v0 }
  0x44   :  { %649 = vmatpush.bf16.msra.mxu1 %v2095_v2 }
  0x45   :  { %662 = vmatpush.bf16.msra.mxu2 %v2112_v21 }
  0x46   :  { %675 = vmatpush.bf16.msra.mxu3 %v2104_v10  ;;  %1596 = vmatmul.msk.bf16.gmra.mxu0 %vm143_vm0, %v1764_v9 }
  0x47   :  { %637 = vmatpush.bf16.msra.mxu0 %v2106_v11  ;;  %1600 = vmatmul.msk.bf16.gmra.mxu1 %vm143_vm0, %v1764_v9 }
  0x48   :  { %650 = vmatpush.bf16.msra.mxu1 %v2110_v15  ;;  %1604 = vmatmul.msk.bf16.gmra.mxu2 %vm143_vm0, %v1764_v9 }
  0x49   :  { %1608 = vmatmul.msk.bf16.gmra.mxu3 %vm143_vm0, %v1764_v9  ;;  %663 = vmatpush.bf16.msra.mxu2 %v2128_v31 }
  0x4a   :  { %676 = vmatpush.bf16.msra.mxu3 %v2116_v22 }
  0x4b   :  { %638 = vmatpush.bf16.msra.mxu0 %v2118_v23 }
  0x4c   :  { %651 = vmatpush.bf16.msra.mxu1 %v2122_v26 }
  0x4d   :  { %664 = vmatpush.bf16.msra.mxu2 %v2140_v53 }
  0x4e   :  { %677 = vmatpush.bf16.msra.mxu3 %v2132_v35 }
  0x4f   :  { %639 = vmatpush.bf16.msra.mxu0 %v2134_v36 }
  0x50   :  { %652 = vmatpush.bf16.msra.mxu1 %v2137_v43 }
  0x51   :  { %665 = vmatpush.bf16.msra.mxu2 %v2152_v1 }
  0x52   :  { %678 = vmatpush.bf16.msra.mxu3 %v2144_v54 }
  0x53   :  { %640 = vmatpush.bf16.msra.mxu0 %v2146_v57 }
  0x54   :  { %653 = vmatpush.bf16.msra.mxu1 %v2149_v60 }
  0x55   :  { %666 = vmatpush.bf16.msra.mxu2 %v2165_v8 }
  0x56   :  { %679 = vmatpush.bf16.msra.mxu3 %v2156_v6  ;;  %514 = vmatmul.bf16.vlgmr.msrb.gmra.mxu0 %v2021_v12 }
  0x57   :  { %527 = vmatmul.bf16.vlgmr.msrb.gmra.mxu1 %v2021_v12  ;;  %760 = vmatpush.bf16.msrb.mxu0 %v2057_v29 }
  0x58   :  { %540 = vmatmul.bf16.vlgmr.msrb.gmra.mxu2 %v2021_v12  ;;  %773 = vmatpush.bf16.msrb.mxu1 %v2059_v30 }
  0x59   :  { %553 = vmatmul.bf16.vlgmr.msrb.gmra.mxu3 %v2021_v12  ;;  %786 = vmatpush.bf16.msrb.mxu2 %v2072_v45 }
  0x5a   :  { %799 = vmatpush.bf16.msrb.mxu3 %v2062_v37 }
  0x5b   :  { %761 = vmatpush.bf16.msrb.mxu0 %v2064_v38 }
  0x5c   :  { %774 = vmatpush.bf16.msrb.mxu1 %v2068_v41 }
  0x5d   :  { %787 = vmatpush.bf16.msrb.mxu2 %v2085_v56 }
  0x5e   :  { %800 = vmatpush.bf16.msrb.mxu3 %v2077_v50 }
  0x5f   :  { %762 = vmatpush.bf16.msrb.mxu0 %v2079_v51 }
  0x60   :  { %775 = vmatpush.bf16.msrb.mxu1 %v2083_v55 }
  0x61   :  { %788 = vmatpush.bf16.msrb.mxu2 %v2097_v4 }
  0x62   :  { %801 = vmatpush.bf16.msrb.mxu3 %v2089_v63 }
  0x63   :  { %763 = vmatpush.bf16.msrb.mxu0 %v2091_v0 }
  0x64   :  { %776 = vmatpush.bf16.msrb.mxu1 %v2095_v2 }
  0x65   :  { %789 = vmatpush.bf16.msrb.mxu2 %v2112_v21 }
  0x66   :  { %802 = vmatpush.bf16.msrb.mxu3 %v2104_v10 }
  0x67   :  { %764 = vmatpush.bf16.msrb.mxu0 %v2106_v11 }
  0x68   :  { %777 = vmatpush.bf16.msrb.mxu1 %v2110_v15 }
  0x69   :  { %790 = vmatpush.bf16.msrb.mxu2 %v2128_v31 }
  0x6a   :  { %803 = vmatpush.bf16.msrb.mxu3 %v2116_v22 }
  0x6b   :  { %765 = vmatpush.bf16.msrb.mxu0 %v2118_v23 }
  0x6c   :  { %778 = vmatpush.bf16.msrb.mxu1 %v2122_v26 }
  0x6d   :  { %791 = vmatpush.bf16.msrb.mxu2 %v2140_v53 }
  0x6e   :  { %804 = vmatpush.bf16.msrb.mxu3 %v2132_v35 }
  0x6f   :  { %766 = vmatpush.bf16.msrb.mxu0 %v2134_v36 }
  0x70   :  { %779 = vmatpush.bf16.msrb.mxu1 %v2137_v43 }
  0x71   :  { %792 = vmatpush.bf16.msrb.mxu2 %v2152_v1 }
  0x72   :  { %805 = vmatpush.bf16.msrb.mxu3 %v2144_v54 }
  0x73   :  { %767 = vmatpush.bf16.msrb.mxu0 %v2146_v57 }
  0x74   :  { %780 = vmatpush.bf16.msrb.mxu1 %v2149_v60 }
  0x75   :  { %793 = vmatpush.bf16.msrb.mxu2 %v2165_v8 }
  0x76   :  { %806 = vmatpush.bf16.msrb.mxu3 %v2156_v6 }
  0x93   :  { %v165_v13 = vpop.f32.mrf.mxu0 }
  0x94   :  { %v194_v14 = vpop.f32.mrf.mxu1 }
  0x9b   :  { %v2245_v18 = vpop.f32.mrf.mxu2  ;;  %v167_v24 = vpop.f32.mrf.mxu0 }
  0x9c   :  { %v2247_v20 = vpop.f32.mrf.mxu3  ;;  %v2249_v25 = vadd.f32 %v167_v24, %v75_v17  ;;  %v196_v27 = vpop.f32.mrf.mxu1 }
  0x9d   :  { %v2251_v28 = vadd.f32 %v196_v27, %v76_v19 }
  0xa3   :  { %v225_v34 = vpop.f32.mrf.mxu2  ;;  %v170_v42 = vpop.f32.mrf.mxu0 }
  0xa4   :  { %v2258_v39 = vadd.f32 %v225_v34, %v2253_v32  ;;  %v254_v40 = vpop.f32.mrf.mxu3  ;;  %v2263_v46 = vadd.f32 %v170_v42, %v75_v17  ;;  %v199_v47 = vpop.f32.mrf.mxu1 }
  0xa5   :  { %v2261_v44 = vadd.f32 %v254_v40, %v2255_v33  ;;  %v2265_v48 = vadd.f32 %v199_v47, %v76_v19 }
  0xab   :  { %v228_v49 = vpop.f32.mrf.mxu2  ;;  %v172_v59 = vpop.f32.mrf.mxu0 }
  0xac   :  { %v2268_v52 = vadd.f32 %v228_v49, %v2253_v32  ;;  %v257_v58 = vpop.f32.mrf.mxu3  ;;  %v2273_v62 = vadd.f32 %v172_v59, %v75_v17  ;;  %v201_v3 = vpop.f32.mrf.mxu1 }
  0xad   :  { %v2271_v61 = vadd.f32 %v257_v58, %v2255_v33  ;;  %v2275_v5 = vadd.f32 %v201_v3, %v76_v19 }
  0xae   :  { %2551 = vst [vmem:[#allocation14_spill] sm:$0xff] %v2268_v52 }
  0xaf   :  { %2552 = vst [vmem:[#allocation15_spill] sm:$0xff] %v2273_v62 }
  0xb0   :  { %2553 = vst [vmem:[#allocation16_spill] sm:$0xff] %v2275_v5 }
  0xb3   :  { %v230_v7 = vpop.f32.mrf.mxu2  ;;  %v175_v16 = vpop.f32.mrf.mxu0 }
  0xb4   :  { %v2278_v9 = vadd.f32 %v230_v7, %v2253_v32  ;;  %v259_v12 = vpop.f32.mrf.mxu3  ;;  %v2283_v27 = vadd.f32 %v175_v16, %v75_v17  ;;  %v204_v34 = vpop.f32.mrf.mxu1 }
  0xb5   :  { %v2281_v24 = vadd.f32 %v259_v12, %v2255_v33  ;;  %v2285_v40 = vadd.f32 %v204_v34, %v76_v19 }
  0xb6   :  { %2554 = vst [vmem:[#allocation17_spill] sm:$0xff] %v2278_v9 }
  0xb7   :  { %2555 = vst [vmem:[#allocation18_spill] sm:$0xff] %v2281_v24 }
  0xb8   :  { %2556 = vst [vmem:[#allocation19_spill] sm:$0xff] %v2283_v27 }
  0xb9   :  { %2557 = vst [vmem:[#allocation20_spill] sm:$0xff] %v2285_v40 }
  0xbb   :  { %v233_v42 = vpop.f32.mrf.mxu2  ;;  %v177_v58 = vpop.f32.mrf.mxu0 }
  0xbc   :  { %v2288_v47 = vadd.f32 %v233_v42, %v2253_v32  ;;  %v262_v49 = vpop.f32.mrf.mxu3  ;;  %v2293_v3 = vadd.f32 %v177_v58, %v75_v17  ;;  %v206_v7 = vpop.f32.mrf.mxu1 }
  0xbd   :  { %v2291_v59 = vadd.f32 %v262_v49, %v2255_v33  ;;  %v2295_v9 = vadd.f32 %v206_v7, %v76_v19 }
  0xbe   :  { %2558 = vst [vmem:[#allocation21_spill] sm:$0xff] %v2288_v47 }
  0xbf   :  { %2559 = vst [vmem:[#allocation22_spill] sm:$0xff] %v2291_v59 }
  0xc0   :  { %2560 = vst [vmem:[#allocation23_spill] sm:$0xff] %v2293_v3 }
  0xc1   :  { %2561 = vst [vmem:[#allocation24_spill] sm:$0xff] %v2295_v9 }
  0xc3   :  { %v235_v12 = vpop.f32.mrf.mxu2  ;;  %v180_v40 = vpop.f32.mrf.mxu0 }
  0xc4   :  { %v2298_v16 = vadd.f32 %v235_v12, %v2253_v32  ;;  %v264_v34 = vpop.f32.mrf.mxu3  ;;  %v2303_v42 = vadd.f32 %v180_v40, %v75_v17  ;;  %v209_v47 = vpop.f32.mrf.mxu1 }
  0xc5   :  { %v2301_v27 = vadd.f32 %v264_v34, %v2255_v33  ;;  %v2305_v24 = vadd.f32 %v209_v47, %v76_v19  ;;  %v166_v34 = vadd.f32 %v165_v13, %v75_v17  ;;  %v253_v13 = vadd.f32 %v2247_v20, %v2255_v33 }
  0xc6   :  { %2562 = vst [vmem:[#allocation25_spill] sm:$0xff] %v2298_v16 }
  0xc7   :  { %2563 = vst [vmem:[#allocation26_spill] sm:$0xff] %v2301_v27 }
  0xc8   :  { %2564 = vst [vmem:[#allocation27_spill] sm:$0xff] %v2303_v42  ;;  %v195_v42 = vadd.f32 %v194_v14, %v76_v19 }
  0xc9   :  { %2565 = vst [vmem:[#allocation28_spill] sm:$0xff] %v2305_v24 }
  0xcb   :  { %v238_v49 = vpop.f32.mrf.mxu2  ;;  %v182_v9 = vpop.f32.mrf.mxu0 }
  0xcc   :  { %v2308_v58 = vadd.f32 %v238_v49, %v2253_v32  ;;  %v267_v7 = vpop.f32.mrf.mxu3  ;;  %v2313_v12 = vadd.f32 %v182_v9, %v75_v17  ;;  %v211_v16 = vpop.f32.mrf.mxu1 }
  0xcd   :  { %v2311_v3 = vadd.f32 %v267_v7, %v2255_v33  ;;  %v2315_v59 = vadd.f32 %v211_v16, %v76_v19 }
  0xce   :  { %2566 = vst [vmem:[#allocation29_spill] sm:$0xff] %v2308_v58 }
  0xcf   :  { %2567 = vst [vmem:[#allocation30_spill] sm:$0xff] %v2311_v3 }
  0xd0   :  { %2568 = vst [vmem:[#allocation31_spill] sm:$0xff] %v2313_v12 }
  0xd1   :  { %2569 = vst [vmem:[#allocation32_spill] sm:$0xff] %v2315_v59 }
  0xd3   :  { %v240_v40 = vpop.f32.mrf.mxu2  ;;  %v515_v27 = vpop.f32.mrf.mxu0 }
  0xd4   :  { %v2318_v47 = vadd.f32 %v240_v40, %v2253_v32  ;;  %v269_v24 = vpop.f32.mrf.mxu3  ;;  %v558_v58 = vadd.f32 %v515_v27, %v166_v34  ;;  %v528_v5 = vpop.f32.mrf.mxu1 }
  0xd5   :  { %v2321_v49 = vadd.f32 %v269_v24, %v2255_v33  ;;  %v559_v7 = vadd.f32 %v528_v5, %v195_v42 }
  0xd6   :  { %2570 = vst [vmem:[#allocation33_spill] sm:$0xff] %v2318_v47  ;;  %v1737_v3 = vmul.f32 -1.442695, %v558_v58 }
  0xd7   :  { %2571 = vst [vmem:[#allocation34_spill] sm:$0xff] %v2321_v49  ;;  %v1738_v9 = vmul.f32 -1.442695, %v559_v7 }
  0xd8   :  { %1811 = vpow2.f32 %v1737_v3  ;;  %v224_v3 = vadd.f32 %v2245_v18, %v2253_v32 }
  0xd9   :  { %1813 = vpow2.f32 %v1738_v9 }
  0xdb   :  { %v541_v17 = vpop.f32.mrf.mxu2  ;;  %v517_v19 = vpop.f32.mrf.mxu0 }
  0xdc   :  { %v554_v14 = vpop.f32.mrf.mxu3  ;;  %v530_v40 = vpop.f32.mrf.mxu1  ;;  %v560_v33 = vadd.f32 %v541_v17, %v224_v3 }
  0xdd   :  { %v561_v16 = vadd.f32 %v554_v14, %v253_v13 }
  0xde   :  { %v1812_v47 = vpop.eup %1811 }
  0xdf   :  { %v1739_v59 = vmul.f32 -1.442695, %v561_v16  ;;  %v1814_v12 = vpop.eup %1813  ;;  %v565_v24 = vadd.f32 1.0, %v1812_v47 }
  0xe0   :  { %v584_v49 = vadd.f32 1.0, %v1814_v12 }
  0xe1   :  { %1815 = vpow2.f32 %v1739_v59  ;;  %v577_v47 = vand.u32 2147483648, %v565_v24  ;;  %v575_v19 = vand.u32 2147483647, %v565_v24  ;;  %vm571_vm3 = vweird.f32 %v565_v24 }
  0xe2   :  { %1817 = vrcp.f32 %v565_v24  ;;  %v596_v59 = vand.u32 2147483648, %v584_v49  ;;  %v594_v40 = vand.u32 2147483647, %v584_v49  ;;  %vm590_vm4 = vweird.f32 %v584_v49 }
  0xe3   :  { %1819 = vrcp.f32 %v584_v49  ;;  %v543_v5 = vpop.f32.mrf.mxu2  ;;  %v578_v17 = vor.u32 1.1754944e-38, %v577_v47  ;;  %vm576_vm6 = vcmp.eq.f32.partialorder %v575_v19, 8.507059e+37 }
  0xe4   :  { %v556_v27 = vpop.f32.mrf.mxu3  ;;  %vm595_vm8 = vcmp.eq.f32.partialorder %v594_v40, 8.507059e+37 }
  0xe5   :  { %v597_v27 = vor.u32 1.1754944e-38, %v596_v59 }
  0xe7   :  { %v1816_v42 = vpop.eup %1815 }
  0xe8   :  { %v1818_v20 = vpop.eup %1817  ;;  %v604_v58 = vadd.f32 1.0, %v1816_v42 }
  0xe9   :  { %v1820_v34 = vpop.eup %1819  ;;  %v567_v7 = vmul.f32 %v1818_v20, %v565_v24  ;;  %vm572_vm1 = vweird.f32 %v1818_v20 }
  0xea   :  { %v586_v9 = vmul.f32 %v1820_v34, %v584_v49  ;;  %1821 = vrcp.f32 %v604_v58  ;;  %vm591_vm2 = vweird.f32 %v1820_v34  ;;  %vm573_vm5 = vmor %vm571_vm3, %vm572_vm1  ;;  %v616_v47 = vand.u32 2147483648, %v604_v58 }
  0xeb   :  { %v568_v13 = vsub.f32 1.0, %v567_v7  ;;  %1823 = vtanh.f32 %v560_v33  ;;  %vm592_vm7 = vmor %vm590_vm4, %vm591_vm2  ;;  %vm610_vm10 = vweird.f32 %v604_v58 }
  0xec   :  { %v587_v14 = vsub.f32 1.0, %v586_v9  ;;  %v617_v19 = vor.u32 1.1754944e-38, %v616_v47 }
  0xed   :  { %v569_v12 = vmul.f32 %v1818_v20, %v568_v13 }
  0xee   :  { %v588_v16 = vmul.f32 %v1820_v34, %v587_v14 }
  0xef   :  { %v570_v18 = vadd.f32 %v1818_v20, %v569_v12 }
  0xf0   :  { %v1822_v32 = vpop.eup %1821  ;;  %v589_v5 = vadd.f32 %v1820_v34, %v588_v16 }
  0xf1   :  { %v574_v3 = vsel %vm573_vm5, %v1818_v20, %v570_v18  ;;  %v606_v42 = vmul.f32 %v1822_v32, %v604_v58  ;;  %v1824_v33 = vpop.eup %1823  ;;  %vm611_vm9 = vweird.f32 %v1822_v32  ;;  %v614_v20 = vand.u32 2147483647, %v604_v58 }
  0xf2   :  { %v579_v7 = vsel %vm576_vm6, %v578_v17, %v574_v3  ;;  %v593_v9 = vsel %vm592_vm7, %v1820_v34, %v589_v5  ;;  %vm612_vm11 = vmor %vm610_vm10, %vm611_vm9 }
  0xf3   :  { %v598_v13 = vsel %vm595_vm8, %v597_v27, %v593_v9  ;;  %v621_v14 = vmul.f32 %v1824_v33, %v579_v7  ;;  %v607_v62 = vsub.f32 1.0, %v606_v42  ;;  %vm615_vm12 = vcmp.eq.f32.partialorder %v614_v20, 8.507059e+37 }
  0xf4   :  { %v620_v52 = vmul.f32 0.0, %v598_v13 }
  0xf5   :  { %v608_v12 = vmul.f32 %v1822_v32, %v607_v62 }
  0xf6   :  { %v2327_v24 = vadd.f32 %v621_v14, %v620_v52 }
  0xf7   :  { %v609_v49 = vadd.f32 %v1822_v32, %v608_v12 }
  0xf8   :  { %1825 = vtanh.f32 %v2327_v24 }
  0xf9   :  { %v613_v59 = vsel %vm612_vm11, %v1822_v32, %v609_v49 }
  0xfa   :  { %v618_v16 = vsel %vm615_vm12, %v617_v19, %v613_v59 }
  0xfe   :  { %v1826_v34 = vpop.eup %1825 }
  0xff   :  { %v624_v40 = vmul.f32 %v1826_v34, %v618_v16 }
 0x101   :  { %v632_v18 = vpack.c.bf16 %v624_v40, %v624_v40 }
 0x103   :  { %641 = vmatmul.bf16.vlgmr.msra.gmra.mxu0 %v632_v18  ;;  %654 = vmatmul.bf16.vlgmr.msra.gmra.mxu1 %v632_v18 }
 0x104   :  { %667 = vmatmul.bf16.vlgmr.msra.gmra.mxu2 %v632_v18  ;;  %680 = vmatmul.bf16.vlgmr.msra.gmra.mxu3 %v632_v18 }
 0x105   :  { %887 = vmatpush.bf16.msra.mxu0 %v2057_v29  ;;  %900 = vmatpush.bf16.msra.mxu1 %v2059_v30 }
 0x106   :  { %913 = vmatpush.bf16.msra.mxu2 %v2072_v45  ;;  %926 = vmatpush.bf16.msra.mxu3 %v2062_v37 }
 0x109   :  { %888 = vmatpush.bf16.msra.mxu0 %v2064_v38  ;;  %901 = vmatpush.bf16.msra.mxu1 %v2068_v41 }
 0x10a   :  { %914 = vmatpush.bf16.msra.mxu2 %v2085_v56  ;;  %927 = vmatpush.bf16.msra.mxu3 %v2077_v50 }
 0x10d   :  { %889 = vmatpush.bf16.msra.mxu0 %v2079_v51  ;;  %902 = vmatpush.bf16.msra.mxu1 %v2083_v55 }
 0x10e   :  { %915 = vmatpush.bf16.msra.mxu2 %v2097_v4  ;;  %928 = vmatpush.bf16.msra.mxu3 %v2089_v63 }
 0x111   :  { %890 = vmatpush.bf16.msra.mxu0 %v2091_v0  ;;  %903 = vmatpush.bf16.msra.mxu1 %v2095_v2 }
 0x112   :  { %916 = vmatpush.bf16.msra.mxu2 %v2112_v21  ;;  %929 = vmatpush.bf16.msra.mxu3 %v2104_v10 }
 0x115   :  { %891 = vmatpush.bf16.msra.mxu0 %v2106_v11  ;;  %904 = vmatpush.bf16.msra.mxu1 %v2110_v15 }
 0x116   :  { %917 = vmatpush.bf16.msra.mxu2 %v2128_v31  ;;  %930 = vmatpush.bf16.msra.mxu3 %v2116_v22 }
 0x119   :  { %892 = vmatpush.bf16.msra.mxu0 %v2118_v23  ;;  %905 = vmatpush.bf16.msra.mxu1 %v2122_v26 }
 0x11a   :  { %918 = vmatpush.bf16.msra.mxu2 %v2140_v53  ;;  %931 = vmatpush.bf16.msra.mxu3 %v2132_v35 }
 0x11d   :  { %893 = vmatpush.bf16.msra.mxu0 %v2134_v36  ;;  %906 = vmatpush.bf16.msra.mxu1 %v2137_v43 }
 0x11e   :  { %919 = vmatpush.bf16.msra.mxu2 %v2152_v1  ;;  %932 = vmatpush.bf16.msra.mxu3 %v2144_v54 }
 0x121   :  { %894 = vmatpush.bf16.msra.mxu0 %v2146_v57  ;;  %907 = vmatpush.bf16.msra.mxu1 %v2149_v60 }
 0x122   :  { %920 = vmatpush.bf16.msra.mxu2 %v2165_v8  ;;  %933 = vmatpush.bf16.msra.mxu3 %v2156_v6 }
 0x180   :  { %v642_v52 = vpop.f32.mrf.mxu0  ;;  %v655_v62 = vpop.f32.mrf.mxu1 }
 0x181   :  { %v685_v58 = vadd.f32 %v642_v52, %v2249_v25  ;;  %v686_v32 = vadd.f32 %v655_v62, %v2251_v28 }
 0x183   :  { %v1740_v17 = vmul.f32 -1.442695, %v685_v58  ;;  %v1741_v5 = vmul.f32 -1.442695, %v686_v32 }
 0x185   :  { %1827 = vpow2.f32 %v1740_v17 }
 0x186   :  { %1829 = vpow2.f32 %v1741_v5 }
 0x187   :  { %v668_v27 = vpop.f32.mrf.mxu2  ;;  %v681_v3 = vpop.f32.mrf.mxu3 }
 0x188   :  { %v688_v42 = vadd.f32 %v681_v3, %v2261_v44  ;;  %v644_v33 = vpop.f32.mrf.mxu0  ;;  %v657_v7 = vpop.f32.mrf.mxu1  ;;  %v687_v19 = vadd.f32 %v668_v27, %v2258_v39 }
 0x18a   :  { %v1742_v9 = vmul.f32 -1.442695, %v688_v42 }
 0x18b   :  { %v1828_v13 = vpop.eup %1827 }
 0x18c   :  { %v1830_v14 = vpop.eup %1829  ;;  %v692_v12 = vadd.f32 1.0, %v1828_v13  ;;  %1831 = vpow2.f32 %v1742_v9 }
 0x18d   :  { %v711_v49 = vadd.f32 1.0, %v1830_v14 }
 0x18e   :  { %1833 = vrcp.f32 %v692_v12  ;;  %v704_v52 = vand.u32 2147483648, %v692_v12  ;;  %v702_v32 = vand.u32 2147483647, %v692_v12  ;;  %vm698_vm15 = vweird.f32 %v692_v12 }
 0x18f   :  { %1835 = vrcp.f32 %v711_v49  ;;  %v670_v25 = vpop.f32.mrf.mxu2  ;;  %v683_v28 = vpop.f32.mrf.mxu3  ;;  %v723_v62 = vand.u32 2147483648, %v711_v49  ;;  %v721_v5 = vand.u32 2147483647, %v711_v49  ;;  %vm717_vm0 = vweird.f32 %v711_v49 }
 0x190   :  { %v705_v39 = vor.u32 1.1754944e-38, %v704_v52  ;;  %vm703_vm3 = vcmp.eq.f32.partialorder %v702_v32, 8.507059e+37 }
 0x191   :  { %v724_v7 = vor.u32 1.1754944e-38, %v723_v62  ;;  %vm722_vm4 = vcmp.eq.f32.partialorder %v721_v5, 8.507059e+37 }
 0x192   :  { %v1832_v47 = vpop.eup %1831 }
 0x193   :  { %v731_v20 = vadd.f32 1.0, %v1832_v47 }
 0x194   :  { %v1834_v59 = vpop.eup %1833 }
 0x195   :  { %v1836_v34 = vpop.eup %1835  ;;  %v694_v16 = vmul.f32 %v1834_v59, %v692_v12  ;;  %1837 = vrcp.f32 %v731_v20  ;;  %vm699_vm13 = vweird.f32 %v1834_v59  ;;  %vm737_vm6 = vweird.f32 %v731_v20 }
 0x196   :  { %v713_v44 = vmul.f32 %v1836_v34, %v711_v49  ;;  %1839 = vtanh.f32 %v687_v19  ;;  %vm718_vm14 = vweird.f32 %v1836_v34  ;;  %vm700_vm1 = vmor %vm698_vm15, %vm699_vm13 }
 0x197   :  { %v695_v40 = vsub.f32 1.0, %v694_v16  ;;  %vm719_vm2 = vmor %vm717_vm0, %vm718_vm14 }
 0x198   :  { %v714_v18 = vsub.f32 1.0, %v713_v44 }
 0x199   :  { %v696_v58 = vmul.f32 %v1834_v59, %v695_v40  ;;  %v743_v40 = vand.u32 2147483648, %v731_v20 }
 0x19a   :  { %v715_v17 = vmul.f32 %v1836_v34, %v714_v18 }
 0x19b   :  { %v1838_v3 = vpop.eup %1837  ;;  %v697_v42 = vadd.f32 %v1834_v59, %v696_v58  ;;  %v744_v52 = vor.u32 1.1754944e-38, %v743_v40 }
 0x19c   :  { %v716_v27 = vadd.f32 %v1836_v34, %v715_v17  ;;  %v733_v33 = vmul.f32 %v1838_v3, %v731_v20  ;;  %v1840_v13 = vpop.eup %1839  ;;  %vm738_vm5 = vweird.f32 %v1838_v3 }
 0x19d   :  { %v701_v9 = vsel %vm700_vm1, %v1834_v59, %v697_v42  ;;  %v741_v59 = vand.u32 2147483647, %v731_v20  ;;  %vm739_vm7 = vmor %vm737_vm6, %vm738_vm5 }
 0x19e   :  { %v706_v14 = vsel %vm703_vm3, %v705_v39, %v701_v9  ;;  %v720_v25 = vsel %vm719_vm2, %v1836_v34, %v716_v27  ;;  %v734_v28 = vsub.f32 1.0, %v733_v33 }
 0x19f   :  { %v725_v47 = vsel %vm722_vm4, %v724_v7, %v720_v25  ;;  %v748_v19 = vmul.f32 %v1840_v13, %v706_v14  ;;  %vm742_vm8 = vcmp.eq.f32.partialorder %v741_v59, 8.507059e+37 }
 0x1a0   :  { %v747_v16 = vmul.f32 %v725_v47, %v2327_v24  ;;  %v735_v44 = vmul.f32 %v1838_v3, %v734_v28 }
 0x1a2   :  { %v2367_v12 = vadd.f32 %v748_v19, %v747_v16  ;;  %v736_v49 = vadd.f32 %v1838_v3, %v735_v44 }
 0x1a4   :  { %1841 = vtanh.f32 %v2367_v12  ;;  %v740_v18 = vsel %vm739_vm7, %v1838_v3, %v736_v49  ;;  %v2572_v49 = vld [vmem:[#allocation14_spill] sm:$0xff] }
 0x1a5   :  { %v745_v62 = vsel %vm742_vm8, %v744_v52, %v740_v18 }
 0x1aa   :  { %v1842_v34 = vpop.eup %1841 }
 0x1ab   :  { %v751_v58 = vmul.f32 %v1842_v34, %v745_v62 }
 0x1ad   :  { %v759_v32 = vpack.c.bf16 %v751_v58, %v751_v58 }
 0x1af   :  { %768 = vmatmul.bf16.vlgmr.msrb.gmra.mxu0 %v759_v32  ;;  %781 = vmatmul.bf16.vlgmr.msrb.gmra.mxu1 %v759_v32 }
 0x1b0   :  { %794 = vmatmul.bf16.vlgmr.msrb.gmra.mxu2 %v759_v32  ;;  %807 = vmatmul.bf16.vlgmr.msrb.gmra.mxu3 %v759_v32 }
 0x1b1   :  { %1014 = vmatpush.bf16.msrb.mxu0 %v2057_v29  ;;  %1027 = vmatpush.bf16.msrb.mxu1 %v2059_v30 }
 0x1b2   :  { %1040 = vmatpush.bf16.msrb.mxu2 %v2072_v45  ;;  %1053 = vmatpush.bf16.msrb.mxu3 %v2062_v37 }
 0x1b5   :  { %1015 = vmatpush.bf16.msrb.mxu0 %v2064_v38  ;;  %1028 = vmatpush.bf16.msrb.mxu1 %v2068_v41 }
 0x1b6   :  { %1041 = vmatpush.bf16.msrb.mxu2 %v2085_v56  ;;  %1054 = vmatpush.bf16.msrb.mxu3 %v2077_v50 }
 0x1b9   :  { %1016 = vmatpush.bf16.msrb.mxu0 %v2079_v51  ;;  %1029 = vmatpush.bf16.msrb.mxu1 %v2083_v55 }
 0x1ba   :  { %1042 = vmatpush.bf16.msrb.mxu2 %v2097_v4  ;;  %1055 = vmatpush.bf16.msrb.mxu3 %v2089_v63 }
 0x1bd   :  { %1017 = vmatpush.bf16.msrb.mxu0 %v2091_v0  ;;  %1030 = vmatpush.bf16.msrb.mxu1 %v2095_v2 }
 0x1be   :  { %1043 = vmatpush.bf16.msrb.mxu2 %v2112_v21  ;;  %1056 = vmatpush.bf16.msrb.mxu3 %v2104_v10 }
 0x1c1   :  { %1018 = vmatpush.bf16.msrb.mxu0 %v2106_v11  ;;  %1031 = vmatpush.bf16.msrb.mxu1 %v2110_v15 }
 0x1c2   :  { %1044 = vmatpush.bf16.msrb.mxu2 %v2128_v31  ;;  %1057 = vmatpush.bf16.msrb.mxu3 %v2116_v22 }
 0x1c5   :  { %1019 = vmatpush.bf16.msrb.mxu0 %v2118_v23  ;;  %1032 = vmatpush.bf16.msrb.mxu1 %v2122_v26 }
 0x1c6   :  { %1045 = vmatpush.bf16.msrb.mxu2 %v2140_v53  ;;  %1058 = vmatpush.bf16.msrb.mxu3 %v2132_v35 }
 0x1c9   :  { %1020 = vmatpush.bf16.msrb.mxu0 %v2134_v36  ;;  %1033 = vmatpush.bf16.msrb.mxu1 %v2137_v43 }
 0x1ca   :  { %1046 = vmatpush.bf16.msrb.mxu2 %v2152_v1  ;;  %1059 = vmatpush.bf16.msrb.mxu3 %v2144_v54 }
 0x1cd   :  { %1021 = vmatpush.bf16.msrb.mxu0 %v2146_v57  ;;  %1034 = vmatpush.bf16.msrb.mxu1 %v2149_v60 }
 0x1ce   :  { %1047 = vmatpush.bf16.msrb.mxu2 %v2165_v8  ;;  %1060 = vmatpush.bf16.msrb.mxu3 %v2156_v6 }
 0x22c   :  { %v769_v24 = vpop.f32.mrf.mxu0  ;;  %v782_v20 = vpop.f32.mrf.mxu1 }
 0x22d   :  { %v812_v17 = vadd.f32 %v769_v24, %v2263_v46  ;;  %v813_v5 = vadd.f32 %v782_v20, %v2265_v48 }
 0x22f   :  { %v1743_v3 = vmul.f32 -1.442695, %v812_v17  ;;  %v1744_v42 = vmul.f32 -1.442695, %v813_v5 }
 0x231   :  { %1843 = vpow2.f32 %v1743_v3 }
 0x232   :  { %1845 = vpow2.f32 %v1744_v42 }
 0x233   :  { %v795_v39 = vpop.f32.mrf.mxu2  ;;  %v808_v27 = vpop.f32.mrf.mxu3 }
 0x234   :  { %v815_v33 = vadd.f32 %v808_v27, %v2271_v61  ;;  %v771_v7 = vpop.f32.mrf.mxu0  ;;  %v784_v9 = vpop.f32.mrf.mxu1  ;;  %v814_v40 = vadd.f32 %v795_v39, %v2572_v49 }
 0x236   :  { %v1745_v13 = vmul.f32 -1.442695, %v815_v33 }
 0x237   :  { %v1844_v14 = vpop.eup %1843 }
 0x238   :  { %v1846_v25 = vpop.eup %1845  ;;  %v819_v28 = vadd.f32 1.0, %v1844_v14  ;;  %1847 = vpow2.f32 %v1745_v13 }
 0x239   :  { %v838_v47 = vadd.f32 1.0, %v1846_v25 }
 0x23a   :  { %1849 = vrcp.f32 %v819_v28  ;;  %v831_v62 = vand.u32 2147483648, %v819_v28  ;;  %v829_v24 = vand.u32 2147483647, %v819_v28  ;;  %vm825_vm11 = vweird.f32 %v819_v28 }
 0x23b   :  { %1851 = vrcp.f32 %v838_v47  ;;  %v797_v46 = vpop.f32.mrf.mxu2  ;;  %v810_v48 = vpop.f32.mrf.mxu3  ;;  %v850_v58 = vand.u32 2147483648, %v838_v47  ;;  %v848_v17 = vand.u32 2147483647, %v838_v47  ;;  %vm844_vm12 = vweird.f32 %v838_v47 }
 0x23c   :  { %v832_v42 = vor.u32 1.1754944e-38, %v831_v62  ;;  %vm830_vm15 = vcmp.eq.f32.partialorder %v829_v24, 8.507059e+37  ;;  %v2574_v24 = vld [vmem:[#allocation16_spill] sm:$0xff] }
 0x23d   :  { %v851_v33 = vor.u32 1.1754944e-38, %v850_v58  ;;  %vm849_vm0 = vcmp.eq.f32.partialorder %v848_v17, 8.507059e+37  ;;  %v2573_v58 = vld [vmem:[#allocation15_spill] sm:$0xff] }
 0x23e   :  { %v1848_v19 = vpop.eup %1847 }
 0x23f   :  { %v858_v16 = vadd.f32 1.0, %v1848_v19 }
 0x240   :  { %v1850_v44 = vpop.eup %1849 }
 0x241   :  { %v1852_v59 = vpop.eup %1851  ;;  %v821_v18 = vmul.f32 %v1850_v44, %v819_v28  ;;  %1853 = vrcp.f32 %v858_v16  ;;  %vm826_vm9 = vweird.f32 %v1850_v44  ;;  %vm864_vm2 = vweird.f32 %v858_v16 }
 0x242   :  { %v840_v61 = vmul.f32 %v1852_v59, %v838_v47  ;;  %1855 = vtanh.f32 %v814_v40  ;;  %vm845_vm10 = vweird.f32 %v1852_v59  ;;  %vm827_vm13 = vmor %vm825_vm11, %vm826_vm9  ;;  %v870_v40 = vand.u32 2147483648, %v858_v16 }
 0x243   :  { %v822_v52 = vsub.f32 1.0, %v821_v18  ;;  %vm846_vm14 = vmor %vm844_vm12, %vm845_vm10 }
 0x244   :  { %v841_v34 = vsub.f32 1.0, %v840_v61  ;;  %v871_v61 = vor.u32 1.1754944e-38, %v870_v40 }
 0x245   :  { %v823_v32 = vmul.f32 %v1850_v44, %v822_v52 }
 0x246   :  { %v842_v20 = vmul.f32 %v1852_v59, %v841_v34 }
 0x247   :  { %v1854_v5 = vpop.eup %1853  ;;  %v824_v3 = vadd.f32 %v1850_v44, %v823_v32 }
 0x248   :  { %v843_v39 = vadd.f32 %v1852_v59, %v842_v20  ;;  %v860_v27 = vmul.f32 %v1854_v5, %v858_v16  ;;  %v1856_v9 = vpop.eup %1855  ;;  %vm865_vm1 = vweird.f32 %v1854_v5 }
 0x249   :  { %v828_v7 = vsel %vm827_vm13, %v1850_v44, %v824_v3  ;;  %v868_v44 = vand.u32 2147483647, %v858_v16  ;;  %vm866_vm3 = vmor %vm864_vm2, %vm865_vm1 }
 0x24a   :  { %v833_v13 = vsel %vm830_vm15, %v832_v42, %v828_v7  ;;  %v847_v14 = vsel %vm846_vm14, %v1852_v59, %v843_v39  ;;  %v861_v25 = vsub.f32 1.0, %v860_v27  ;;  %v2575_v39 = vld [vmem:[#allocation18_spill] sm:$0xff] }
 0x24b   :  { %v852_v46 = vsel %vm849_vm0, %v851_v33, %v847_v14  ;;  %v875_v48 = vmul.f32 %v1856_v9, %v833_v13  ;;  %vm869_vm4 = vcmp.eq.f32.partialorder %v868_v44, 8.507059e+37  ;;  %v2576_v44 = vld [vmem:[#allocation17_spill] sm:$0xff] }
 0x24c   :  { %v874_v19 = vmul.f32 %v852_v46, %v2367_v12  ;;  %v862_v49 = vmul.f32 %v1854_v5, %v861_v25 }
 0x24e   :  { %v2407_v28 = vadd.f32 %v875_v48, %v874_v19  ;;  %v863_v47 = vadd.f32 %v1854_v5, %v862_v49 }
 0x250   :  { %1857 = vtanh.f32 %v2407_v28  ;;  %v867_v18 = vsel %vm866_vm3, %v1854_v5, %v863_v47 }
 0x251   :  { %v872_v52 = vsel %vm869_vm4, %v871_v61, %v867_v18 }
 0x256   :  { %v1858_v59 = vpop.eup %1857 }
 0x257   :  { %v878_v34 = vmul.f32 %v1858_v59, %v872_v52 }
 0x259   :  { %v886_v62 = vpack.c.bf16 %v878_v34, %v878_v34 }
 0x25b   :  { %895 = vmatmul.bf16.vlgmr.msra.gmra.mxu0 %v886_v62  ;;  %908 = vmatmul.bf16.vlgmr.msra.gmra.mxu1 %v886_v62 }
 0x25c   :  { %921 = vmatmul.bf16.vlgmr.msra.gmra.mxu2 %v886_v62  ;;  %934 = vmatmul.bf16.vlgmr.msra.gmra.mxu3 %v886_v62 }
 0x25d   :  { %1141 = vmatpush.bf16.msra.mxu0 %v2057_v29  ;;  %1154 = vmatpush.bf16.msra.mxu1 %v2059_v30 }
 0x25e   :  { %1167 = vmatpush.bf16.msra.mxu2 %v2072_v45  ;;  %1180 = vmatpush.bf16.msra.mxu3 %v2062_v37 }
 0x261   :  { %1142 = vmatpush.bf16.msra.mxu0 %v2064_v38  ;;  %1155 = vmatpush.bf16.msra.mxu1 %v2068_v41 }
 0x262   :  { %1168 = vmatpush.bf16.msra.mxu2 %v2085_v56  ;;  %1181 = vmatpush.bf16.msra.mxu3 %v2077_v50 }
 0x265   :  { %1143 = vmatpush.bf16.msra.mxu0 %v2079_v51  ;;  %1156 = vmatpush.bf16.msra.mxu1 %v2083_v55 }
 0x266   :  { %1169 = vmatpush.bf16.msra.mxu2 %v2097_v4  ;;  %1182 = vmatpush.bf16.msra.mxu3 %v2089_v63 }
 0x269   :  { %1144 = vmatpush.bf16.msra.mxu0 %v2091_v0  ;;  %1157 = vmatpush.bf16.msra.mxu1 %v2095_v2 }
 0x26a   :  { %1170 = vmatpush.bf16.msra.mxu2 %v2112_v21  ;;  %1183 = vmatpush.bf16.msra.mxu3 %v2104_v10 }
 0x26d   :  { %1145 = vmatpush.bf16.msra.mxu0 %v2106_v11  ;;  %1158 = vmatpush.bf16.msra.mxu1 %v2110_v15 }
 0x26e   :  { %1171 = vmatpush.bf16.msra.mxu2 %v2128_v31  ;;  %1184 = vmatpush.bf16.msra.mxu3 %v2116_v22 }
 0x271   :  { %1146 = vmatpush.bf16.msra.mxu0 %v2118_v23  ;;  %1159 = vmatpush.bf16.msra.mxu1 %v2122_v26 }
 0x272   :  { %1172 = vmatpush.bf16.msra.mxu2 %v2140_v53  ;;  %1185 = vmatpush.bf16.msra.mxu3 %v2132_v35 }
 0x275   :  { %1147 = vmatpush.bf16.msra.mxu0 %v2134_v36  ;;  %1160 = vmatpush.bf16.msra.mxu1 %v2137_v43 }
 0x276   :  { %1173 = vmatpush.bf16.msra.mxu2 %v2152_v1  ;;  %1186 = vmatpush.bf16.msra.mxu3 %v2144_v54 }
 0x279   :  { %1148 = vmatpush.bf16.msra.mxu0 %v2146_v57  ;;  %1161 = vmatpush.bf16.msra.mxu1 %v2149_v60 }
 0x27a   :  { %1174 = vmatpush.bf16.msra.mxu2 %v2165_v8  ;;  %1187 = vmatpush.bf16.msra.mxu3 %v2156_v6 }
 0x2d8   :  { %v896_v12 = vpop.f32.mrf.mxu0  ;;  %v909_v16 = vpop.f32.mrf.mxu1 }
 0x2d9   :  { %v939_v32 = vadd.f32 %v896_v12, %v2573_v58  ;;  %v940_v20 = vadd.f32 %v909_v16, %v2574_v24 }
 0x2db   :  { %v1746_v17 = vmul.f32 -1.442695, %v939_v32  ;;  %v1747_v5 = vmul.f32 -1.442695, %v940_v20 }
 0x2dd   :  { %1859 = vpow2.f32 %v1746_v17 }
 0x2de   :  { %1861 = vpow2.f32 %v1747_v5 }
 0x2df   :  { %v922_v3 = vpop.f32.mrf.mxu2  ;;  %v935_v42 = vpop.f32.mrf.mxu3 }
 0x2e0   :  { %v942_v27 = vadd.f32 %v935_v42, %v2575_v39  ;;  %v898_v33 = vpop.f32.mrf.mxu0  ;;  %v911_v7 = vpop.f32.mrf.mxu1  ;;  %v941_v18 = vadd.f32 %v922_v3, %v2576_v44 }
 0x2e2   :  { %v1748_v9 = vmul.f32 -1.442695, %v942_v27 }
 0x2e3   :  { %v1860_v13 = vpop.eup %1859 }
 0x2e4   :  { %v1862_v14 = vpop.eup %1861  ;;  %v946_v25 = vadd.f32 1.0, %v1860_v13  ;;  %1863 = vpow2.f32 %v1748_v9 }
 0x2e5   :  { %v965_v46 = vadd.f32 1.0, %v1862_v14 }
 0x2e6   :  { %1865 = vrcp.f32 %v946_v25  ;;  %v958_v12 = vand.u32 2147483648, %v946_v25  ;;  %v956_v32 = vand.u32 2147483647, %v946_v25  ;;  %vm952_vm7 = vweird.f32 %v946_v25 }
 0x2e7   :  { %1867 = vrcp.f32 %v965_v46  ;;  %v924_v48 = vpop.f32.mrf.mxu2  ;;  %v937_v19 = vpop.f32.mrf.mxu3  ;;  %v977_v16 = vand.u32 2147483648, %v965_v46  ;;  %v975_v20 = vand.u32 2147483647, %v965_v46  ;;  %vm971_vm8 = vweird.f32 %v965_v46 }
 0x2e8   :  { %v959_v3 = vor.u32 1.1754944e-38, %v958_v12  ;;  %vm957_vm11 = vcmp.eq.f32.partialorder %v956_v32, 8.507059e+37  ;;  %v2578_v32 = vld [vmem:[#allocation20_spill] sm:$0xff] }
 0x2e9   :  { %v978_v27 = vor.u32 1.1754944e-38, %v977_v16  ;;  %vm976_vm12 = vcmp.eq.f32.partialorder %v975_v20, 8.507059e+37  ;;  %v2577_v16 = vld [vmem:[#allocation19_spill] sm:$0xff] }
 0x2ea   :  { %v1864_v49 = vpop.eup %1863 }
 0x2eb   :  { %v985_v47 = vadd.f32 1.0, %v1864_v49 }
 0x2ec   :  { %v1866_v40 = vpop.eup %1865 }
 0x2ed   :  { %v1868_v61 = vpop.eup %1867  ;;  %v948_v59 = vmul.f32 %v1866_v40, %v946_v25  ;;  %1869 = vrcp.f32 %v985_v47  ;;  %vm953_vm5 = vweird.f32 %v1866_v40  ;;  %vm991_vm14 = vweird.f32 %v985_v47 }
 0x2ee   :  { %v967_v52 = vmul.f32 %v1868_v61, %v965_v46  ;;  %1871 = vtanh.f32 %v941_v18  ;;  %vm972_vm6 = vweird.f32 %v1868_v61  ;;  %vm954_vm9 = vmor %vm952_vm7, %vm953_vm5  ;;  %v997_v18 = vand.u32 2147483648, %v985_v47 }
 0x2ef   :  { %v949_v34 = vsub.f32 1.0, %v948_v59  ;;  %vm973_vm10 = vmor %vm971_vm8, %vm972_vm6 }
 0x2f0   :  { %v968_v62 = vsub.f32 1.0, %v967_v52  ;;  %v998_v52 = vor.u32 1.1754944e-38, %v997_v18 }
 0x2f1   :  { %v950_v58 = vmul.f32 %v1866_v40, %v949_v34 }
 0x2f2   :  { %v969_v24 = vmul.f32 %v1868_v61, %v968_v62 }
 0x2f3   :  { %v1870_v17 = vpop.eup %1869  ;;  %v951_v5 = vadd.f32 %v1866_v40, %v950_v58 }
 0x2f4   :  { %v970_v42 = vadd.f32 %v1868_v61, %v969_v24  ;;  %v987_v39 = vmul.f32 %v1870_v17, %v985_v47  ;;  %v1872_v7 = vpop.eup %1871  ;;  %vm992_vm13 = vweird.f32 %v1870_v17 }
 0x2f5   :  { %v955_v33 = vsel %vm954_vm9, %v1866_v40, %v951_v5  ;;  %v995_v40 = vand.u32 2147483647, %v985_v47  ;;  %vm993_vm15 = vmor %vm991_vm14, %vm992_vm13 }
 0x2f6   :  { %v960_v9 = vsel %vm957_vm11, %v959_v3, %v955_v33  ;;  %v974_v13 = vsel %vm973_vm10, %v1868_v61, %v970_v42  ;;  %v988_v14 = vsub.f32 1.0, %v987_v39  ;;  %v2579_v42 = vld [vmem:[#allocation22_spill] sm:$0xff] }
 0x2f7   :  { %v979_v48 = vsel %vm976_vm12, %v978_v27, %v974_v13  ;;  %v1002_v19 = vmul.f32 %v1872_v7, %v960_v9  ;;  %vm996_vm0 = vcmp.eq.f32.partialorder %v995_v40, 8.507059e+37  ;;  %v2580_v40 = vld [vmem:[#allocation21_spill] sm:$0xff] }
 0x2f8   :  { %v1001_v49 = vmul.f32 %v979_v48, %v2407_v28  ;;  %v989_v44 = vmul.f32 %v1870_v17, %v988_v14 }
 0x2fa   :  { %v2447_v25 = vadd.f32 %v1002_v19, %v1001_v49  ;;  %v990_v46 = vadd.f32 %v1870_v17, %v989_v44 }
 0x2fc   :  { %1873 = vtanh.f32 %v2447_v25  ;;  %v994_v59 = vsel %vm993_vm15, %v1870_v17, %v990_v46 }
 0x2fd   :  { %v999_v34 = vsel %vm996_vm0, %v998_v52, %v994_v59 }
 0x302   :  { %v1874_v61 = vpop.eup %1873 }
 0x303   :  { %v1005_v62 = vmul.f32 %v1874_v61, %v999_v34 }
 0x305   :  { %v1013_v12 = vpack.c.bf16 %v1005_v62, %v1005_v62 }
 0x307   :  { %1022 = vmatmul.bf16.vlgmr.msrb.gmra.mxu0 %v1013_v12  ;;  %1035 = vmatmul.bf16.vlgmr.msrb.gmra.mxu1 %v1013_v12 }
 0x308   :  { %1048 = vmatmul.bf16.vlgmr.msrb.gmra.mxu2 %v1013_v12  ;;  %1061 = vmatmul.bf16.vlgmr.msrb.gmra.mxu3 %v1013_v12 }
 0x309   :  { %1268 = vmatpush.bf16.msrb.mxu0 %v2057_v29  ;;  %1281 = vmatpush.bf16.msrb.mxu1 %v2059_v30 }
 0x30a   :  { %1294 = vmatpush.bf16.msrb.mxu2 %v2072_v45  ;;  %1307 = vmatpush.bf16.msrb.mxu3 %v2062_v37 }
 0x30d   :  { %1269 = vmatpush.bf16.msrb.mxu0 %v2064_v38  ;;  %1282 = vmatpush.bf16.msrb.mxu1 %v2068_v41 }
 0x30e   :  { %1295 = vmatpush.bf16.msrb.mxu2 %v2085_v56  ;;  %1308 = vmatpush.bf16.msrb.mxu3 %v2077_v50 }
 0x311   :  { %1270 = vmatpush.bf16.msrb.mxu0 %v2079_v51  ;;  %1283 = vmatpush.bf16.msrb.mxu1 %v2083_v55 }
 0x312   :  { %1296 = vmatpush.bf16.msrb.mxu2 %v2097_v4  ;;  %1309 = vmatpush.bf16.msrb.mxu3 %v2089_v63 }
 0x315   :  { %1271 = vmatpush.bf16.msrb.mxu0 %v2091_v0  ;;  %1284 = vmatpush.bf16.msrb.mxu1 %v2095_v2 }
 0x316   :  { %1297 = vmatpush.bf16.msrb.mxu2 %v2112_v21  ;;  %1310 = vmatpush.bf16.msrb.mxu3 %v2104_v10 }
 0x319   :  { %1272 = vmatpush.bf16.msrb.mxu0 %v2106_v11  ;;  %1285 = vmatpush.bf16.msrb.mxu1 %v2110_v15 }
 0x31a   :  { %1298 = vmatpush.bf16.msrb.mxu2 %v2128_v31  ;;  %1311 = vmatpush.bf16.msrb.mxu3 %v2116_v22 }
 0x31d   :  { %1273 = vmatpush.bf16.msrb.mxu0 %v2118_v23  ;;  %1286 = vmatpush.bf16.msrb.mxu1 %v2122_v26 }
 0x31e   :  { %1299 = vmatpush.bf16.msrb.mxu2 %v2140_v53  ;;  %1312 = vmatpush.bf16.msrb.mxu3 %v2132_v35 }
 0x321   :  { %1274 = vmatpush.bf16.msrb.mxu0 %v2134_v36  ;;  %1287 = vmatpush.bf16.msrb.mxu1 %v2137_v43 }
 0x322   :  { %1300 = vmatpush.bf16.msrb.mxu2 %v2152_v1  ;;  %1313 = vmatpush.bf16.msrb.mxu3 %v2144_v54 }
 0x325   :  { %1275 = vmatpush.bf16.msrb.mxu0 %v2146_v57  ;;  %1288 = vmatpush.bf16.msrb.mxu1 %v2149_v60 }
 0x326   :  { %1301 = vmatpush.bf16.msrb.mxu2 %v2165_v8  ;;  %1314 = vmatpush.bf16.msrb.mxu3 %v2156_v6 }
 0x384   :  { %v1023_v28 = vpop.f32.mrf.mxu0  ;;  %v1036_v47 = vpop.f32.mrf.mxu1 }
 0x385   :  { %v1066_v58 = vadd.f32 %v1023_v28, %v2577_v16  ;;  %v1067_v24 = vadd.f32 %v1036_v47, %v2578_v32 }
 0x387   :  { %v1749_v20 = vmul.f32 -1.442695, %v1066_v58  ;;  %v1750_v17 = vmul.f32 -1.442695, %v1067_v24 }
 0x389   :  { %1875 = vpow2.f32 %v1749_v20 }
 0x38a   :  { %1877 = vpow2.f32 %v1750_v17 }
 0x38b   :  { %v1049_v5 = vpop.f32.mrf.mxu2  ;;  %v1062_v3 = vpop.f32.mrf.mxu3 }
 0x38c   :  { %v1069_v39 = vadd.f32 %v1062_v3, %v2579_v42  ;;  %v1025_v27 = vpop.f32.mrf.mxu0  ;;  %v1038_v33 = vpop.f32.mrf.mxu1  ;;  %v1068_v59 = vadd.f32 %v1049_v5, %v2580_v40 }
 0x38e   :  { %v1751_v7 = vmul.f32 -1.442695, %v1069_v39 }
 0x38f   :  { %v1876_v9 = vpop.eup %1875 }
 0x390   :  { %v1878_v13 = vpop.eup %1877  ;;  %v1073_v14 = vadd.f32 1.0, %v1876_v9  ;;  %1879 = vpow2.f32 %v1751_v7 }
 0x391   :  { %v1092_v48 = vadd.f32 1.0, %v1878_v13 }
 0x392   :  { %1881 = vrcp.f32 %v1073_v14  ;;  %v1085_v28 = vand.u32 2147483648, %v1073_v14  ;;  %v1083_v58 = vand.u32 2147483647, %v1073_v14  ;;  %vm1079_vm3 = vweird.f32 %v1073_v14 }
 0x393   :  { %1883 = vrcp.f32 %v1092_v48  ;;  %v1051_v19 = vpop.f32.mrf.mxu2  ;;  %v1064_v49 = vpop.f32.mrf.mxu3  ;;  %v1104_v47 = vand.u32 2147483648, %v1092_v48  ;;  %v1102_v24 = vand.u32 2147483647, %v1092_v48  ;;  %vm1098_vm4 = vweird.f32 %v1092_v48 }
 0x394   :  { %v1086_v5 = vor.u32 1.1754944e-38, %v1085_v28  ;;  %vm1084_vm7 = vcmp.eq.f32.partialorder %v1083_v58, 8.507059e+37 }
 0x395   :  { %v1105_v39 = vor.u32 1.1754944e-38, %v1104_v47  ;;  %vm1103_vm8 = vcmp.eq.f32.partialorder %v1102_v24, 8.507059e+37 }
 0x396   :  { %v1880_v44 = vpop.eup %1879 }
 0x397   :  { %v1112_v46 = vadd.f32 1.0, %v1880_v44 }
 0x398   :  { %v1882_v18 = vpop.eup %1881 }
 0x399   :  { %v1884_v52 = vpop.eup %1883  ;;  %v1075_v61 = vmul.f32 %v1882_v18, %v1073_v14  ;;  %1885 = vrcp.f32 %v1112_v46  ;;  %vm1080_vm1 = vweird.f32 %v1882_v18  ;;  %vm1118_vm10 = vweird.f32 %v1112_v46 }
 0x39a   :  { %v1094_v34 = vmul.f32 %v1884_v52, %v1092_v48  ;;  %1887 = vtanh.f32 %v1068_v59  ;;  %vm1099_vm2 = vweird.f32 %v1884_v52  ;;  %vm1081_vm5 = vmor %vm1079_vm3, %vm1080_vm1  ;;  %v1124_v59 = vand.u32 2147483648, %v1112_v46 }
 0x39b   :  { %v1076_v62 = vsub.f32 1.0, %v1075_v61  ;;  %vm1100_vm6 = vmor %vm1098_vm4, %vm1099_vm2 }
 0x39c   :  { %v1095_v12 = vsub.f32 1.0, %v1094_v34  ;;  %v1125_v34 = vor.u32 1.1754944e-38, %v1124_v59 }
 0x39d   :  { %v1077_v16 = vmul.f32 %v1882_v18, %v1076_v62 }
 0x39e   :  { %v1096_v32 = vmul.f32 %v1884_v52, %v1095_v12 }
 0x39f   :  { %v1886_v20 = vpop.eup %1885  ;;  %v1078_v17 = vadd.f32 %v1882_v18, %v1077_v16 }
 0x3a0   :  { %v1097_v3 = vadd.f32 %v1884_v52, %v1096_v32  ;;  %v1114_v42 = vmul.f32 %v1886_v20, %v1112_v46  ;;  %v1888_v33 = vpop.eup %1887  ;;  %vm1119_vm9 = vweird.f32 %v1886_v20 }
 0x3a1   :  { %v1082_v27 = vsel %vm1081_vm5, %v1882_v18, %v1078_v17  ;;  %v1122_v18 = vand.u32 2147483647, %v1112_v46  ;;  %vm1120_vm11 = vmor %vm1118_vm10, %vm1119_vm9 }
 0x3a2   :  { %v1087_v7 = vsel %vm1084_vm7, %v1086_v5, %v1082_v27  ;;  %v1101_v9 = vsel %vm1100_vm6, %v1884_v52, %v1097_v3  ;;  %v1115_v13 = vsub.f32 1.0, %v1114_v42 }
 0x3a3   :  { %v1106_v19 = vsel %vm1103_vm8, %v1105_v39, %v1101_v9  ;;  %v1129_v49 = vmul.f32 %v1888_v33, %v1087_v7  ;;  %vm1123_vm12 = vcmp.eq.f32.partialorder %v1122_v18, 8.507059e+37 }
 0x3a4   :  { %v1128_v44 = vmul.f32 %v1106_v19, %v2447_v25  ;;  %v1116_v40 = vmul.f32 %v1886_v20, %v1115_v13 }
 0x3a6   :  { %v2487_v14 = vadd.f32 %v1129_v49, %v1128_v44  ;;  %v1117_v48 = vadd.f32 %v1886_v20, %v1116_v40 }
 0x3a8   :  { %1889 = vtanh.f32 %v2487_v14  ;;  %v1121_v61 = vsel %vm1120_vm11, %v1886_v20, %v1117_v48 }
 0x3a9   :  { %v1126_v62 = vsel %vm1123_vm12, %v1125_v34, %v1121_v61 }
 0x3ae   :  { %v1890_v52 = vpop.eup %1889 }
 0x3af   :  { %v1132_v12 = vmul.f32 %v1890_v52, %v1126_v62 }
 0x3b1   :  { %v1140_v28 = vpack.c.bf16 %v1132_v12, %v1132_v12 }
 0x3b3   :  { %1149 = vmatmul.bf16.vlgmr.msra.gmra.mxu0 %v1140_v28  ;;  %1162 = vmatmul.bf16.vlgmr.msra.gmra.mxu1 %v1140_v28 }
 0x3b4   :  { %1175 = vmatmul.bf16.vlgmr.msra.gmra.mxu2 %v1140_v28  ;;  %1188 = vmatmul.bf16.vlgmr.msra.gmra.mxu3 %v1140_v28 }
 0x3b5   :  { %1395 = vmatpush.bf16.msra.mxu0 %v2057_v29  ;;  %1408 = vmatpush.bf16.msra.mxu1 %v2059_v30 }
 0x3b6   :  { %1421 = vmatpush.bf16.msra.mxu2 %v2072_v45  ;;  %1434 = vmatpush.bf16.msra.mxu3 %v2062_v37  ;;  %v2581_v37 = vld [vmem:[#allocation23_spill] sm:$0xff] }
 0x3b9   :  { %1396 = vmatpush.bf16.msra.mxu0 %v2064_v38  ;;  %1409 = vmatpush.bf16.msra.mxu1 %v2068_v41  ;;  %v2582_v41 = vld [vmem:[#allocation24_spill] sm:$0xff] }
 0x3ba   :  { %1422 = vmatpush.bf16.msra.mxu2 %v2085_v56  ;;  %1435 = vmatpush.bf16.msra.mxu3 %v2077_v50 }
 0x3bd   :  { %1397 = vmatpush.bf16.msra.mxu0 %v2079_v51  ;;  %1410 = vmatpush.bf16.msra.mxu1 %v2083_v55 }
 0x3be   :  { %1423 = vmatpush.bf16.msra.mxu2 %v2097_v4  ;;  %1436 = vmatpush.bf16.msra.mxu3 %v2089_v63  ;;  %v2583_v63 = vld [vmem:[#allocation26_spill] sm:$0xff] }
 0x3c1   :  { %1398 = vmatpush.bf16.msra.mxu0 %v2091_v0  ;;  %1411 = vmatpush.bf16.msra.mxu1 %v2095_v2 }
 0x3c2   :  { %1424 = vmatpush.bf16.msra.mxu2 %v2112_v21  ;;  %1437 = vmatpush.bf16.msra.mxu3 %v2104_v10 }
 0x3c5   :  { %1399 = vmatpush.bf16.msra.mxu0 %v2106_v11  ;;  %1412 = vmatpush.bf16.msra.mxu1 %v2110_v15 }
 0x3c6   :  { %1425 = vmatpush.bf16.msra.mxu2 %v2128_v31  ;;  %1438 = vmatpush.bf16.msra.mxu3 %v2116_v22 }
 0x3c9   :  { %1400 = vmatpush.bf16.msra.mxu0 %v2118_v23  ;;  %1413 = vmatpush.bf16.msra.mxu1 %v2122_v26 }
 0x3ca   :  { %1426 = vmatpush.bf16.msra.mxu2 %v2140_v53  ;;  %1439 = vmatpush.bf16.msra.mxu3 %v2132_v35 }
 0x3cd   :  { %1401 = vmatpush.bf16.msra.mxu0 %v2134_v36  ;;  %1414 = vmatpush.bf16.msra.mxu1 %v2137_v43  ;;  %v2584_v43 = vld [vmem:[#allocation25_spill] sm:$0xff] }
 0x3ce   :  { %1427 = vmatpush.bf16.msra.mxu2 %v2152_v1  ;;  %1440 = vmatpush.bf16.msra.mxu3 %v2144_v54 }
 0x3d1   :  { %1402 = vmatpush.bf16.msra.mxu0 %v2146_v57  ;;  %1415 = vmatpush.bf16.msra.mxu1 %v2149_v60 }
 0x3d2   :  { %1428 = vmatpush.bf16.msra.mxu2 %v2165_v8  ;;  %1441 = vmatpush.bf16.msra.mxu3 %v2156_v6 }
 0x430   :  { %v1150_v29 = vpop.f32.mrf.mxu0  ;;  %v1163_v30 = vpop.f32.mrf.mxu1 }
 0x431   :  { %v1193_v38 = vadd.f32 %v1150_v29, %v2581_v37  ;;  %v1194_v45 = vadd.f32 %v1163_v30, %v2582_v41  ;;  %v2585_v29 = vld [vmem:[#allocation27_spill] sm:$0xff]  ;;  %v2586_v37 = vld [vmem:[#allocation28_spill] sm:$0xff] }
 0x433   :  { %v1752_v50 = vmul.f32 -1.442695, %v1193_v38  ;;  %v1753_v51 = vmul.f32 -1.442695, %v1194_v45 }
 0x435   :  { %1891 = vpow2.f32 %v1752_v50 }
 0x436   :  { %1893 = vpow2.f32 %v1753_v51 }
 0x437   :  { %v1176_v55 = vpop.f32.mrf.mxu2  ;;  %v1189_v56 = vpop.f32.mrf.mxu3 }
 0x438   :  { %v1196_v0 = vadd.f32 %v1189_v56, %v2583_v63  ;;  %v1152_v2 = vpop.f32.mrf.mxu0  ;;  %v1165_v4 = vpop.f32.mrf.mxu1  ;;  %v1195_v53 = vadd.f32 %v1176_v55, %v2584_v43  ;;  %v2587_v55 = vld [vmem:[#allocation30_spill] sm:$0xff] }
 0x43a   :  { %v1754_v10 = vmul.f32 -1.442695, %v1196_v0 }
 0x43b   :  { %v1892_v11 = vpop.eup %1891 }
 0x43c   :  { %v1894_v15 = vpop.eup %1893  ;;  %v1200_v21 = vadd.f32 1.0, %v1892_v11  ;;  %1895 = vpow2.f32 %v1754_v10 }
 0x43d   :  { %v1219_v22 = vadd.f32 1.0, %v1894_v15 }
 0x43e   :  { %1897 = vrcp.f32 %v1200_v21  ;;  %v1212_v8 = vand.u32 2147483648, %v1200_v21  ;;  %v1210_v47 = vand.u32 2147483647, %v1200_v21  ;;  %vm1206_vm15 = vweird.f32 %v1200_v21 }
 0x43f   :  { %1899 = vrcp.f32 %v1219_v22  ;;  %v1178_v23 = vpop.f32.mrf.mxu2  ;;  %v1191_v26 = vpop.f32.mrf.mxu3  ;;  %v1231_v25 = vand.u32 2147483648, %v1219_v22  ;;  %v1229_v58 = vand.u32 2147483647, %v1219_v22  ;;  %vm1225_vm0 = vweird.f32 %v1219_v22 }
 0x440   :  { %v1213_v20 = vor.u32 1.1754944e-38, %v1212_v8  ;;  %vm1211_vm3 = vcmp.eq.f32.partialorder %v1210_v47, 8.507059e+37 }
 0x441   :  { %v1232_v3 = vor.u32 1.1754944e-38, %v1231_v25  ;;  %vm1230_vm4 = vcmp.eq.f32.partialorder %v1229_v58, 8.507059e+37 }
 0x442   :  { %v1896_v31 = vpop.eup %1895 }
 0x443   :  { %v1239_v35 = vadd.f32 1.0, %v1896_v31 }
 0x444   :  { %v1898_v36 = vpop.eup %1897 }
 0x445   :  { %v1900_v54 = vpop.eup %1899  ;;  %v1202_v57 = vmul.f32 %v1898_v36, %v1200_v21  ;;  %1901 = vrcp.f32 %v1239_v35  ;;  %vm1207_vm13 = vweird.f32 %v1898_v36  ;;  %v1251_v48 = vand.u32 2147483648, %v1239_v35 }
 0x446   :  { %v1221_v60 = vmul.f32 %v1900_v54, %v1219_v22  ;;  %1903 = vtanh.f32 %v1195_v53  ;;  %vm1226_vm14 = vweird.f32 %v1900_v54  ;;  %vm1208_vm1 = vmor %vm1206_vm15, %vm1207_vm13  ;;  %vm1245_vm6 = vweird.f32 %v1239_v35 }
 0x447   :  { %v1203_v1 = vsub.f32 1.0, %v1202_v57  ;;  %vm1227_vm2 = vmor %vm1225_vm0, %vm1226_vm14  ;;  %v1249_v59 = vand.u32 2147483647, %v1239_v35  ;;  %v1252_v61 = vor.u32 1.1754944e-38, %v1251_v48 }
 0x448   :  { %v1222_v6 = vsub.f32 1.0, %v1221_v60 }
 0x449   :  { %v1204_v46 = vmul.f32 %v1898_v36, %v1203_v1  ;;  %vm1250_vm8 = vcmp.eq.f32.partialorder %v1249_v59, 8.507059e+37 }
 0x44a   :  { %v1223_v16 = vmul.f32 %v1900_v54, %v1222_v6 }
 0x44b   :  { %v1902_v32 = vpop.eup %1901  ;;  %v1205_v24 = vadd.f32 %v1898_v36, %v1204_v46 }
 0x44c   :  { %v1224_v17 = vadd.f32 %v1900_v54, %v1223_v16  ;;  %v1241_v5 = vmul.f32 %v1902_v32, %v1239_v35  ;;  %v1904_v39 = vpop.eup %1903  ;;  %vm1246_vm5 = vweird.f32 %v1902_v32  ;;  %v2588_v35 = vld [vmem:[#allocation29_spill] sm:$0xff] }
 0x44d   :  { %v1209_v42 = vsel %vm1208_vm1, %v1898_v36, %v1205_v24  ;;  %vm1247_vm7 = vmor %vm1245_vm6, %vm1246_vm5 }
 0x44e   :  { %v1214_v27 = vsel %vm1211_vm3, %v1213_v20, %v1209_v42  ;;  %v1228_v33 = vsel %vm1227_vm2, %v1900_v54, %v1224_v17  ;;  %v1242_v7 = vsub.f32 1.0, %v1241_v5 }
 0x44f   :  { %v1233_v9 = vsel %vm1230_vm4, %v1232_v3, %v1228_v33  ;;  %v1256_v13 = vmul.f32 %v1904_v39, %v1214_v27 }
 0x450   :  { %v1255_v19 = vmul.f32 %v1233_v9, %v2487_v14  ;;  %v1243_v49 = vmul.f32 %v1902_v32, %v1242_v7 }
 0x452   :  { %v2527_v44 = vadd.f32 %v1256_v13, %v1255_v19  ;;  %v1244_v40 = vadd.f32 %v1902_v32, %v1243_v49 }
 0x454   :  { %1905 = vtanh.f32 %v2527_v44  ;;  %v1248_v18 = vsel %vm1247_vm7, %v1902_v32, %v1244_v40 }
 0x455   :  { %v1253_v52 = vsel %vm1250_vm8, %v1252_v61, %v1248_v18 }
 0x45a   :  { %v1906_v34 = vpop.eup %1905 }
 0x45b   :  { %v1259_v62 = vmul.f32 %v1906_v34, %v1253_v52 }
 0x45d   :  { %v1267_v12 = vpack.c.bf16 %v1259_v62, %v1259_v62 }
 0x45f   :  { %1276 = vmatmul.bf16.vlgmr.msrb.gmra.mxu0 %v1267_v12  ;;  %1289 = vmatmul.bf16.vlgmr.msrb.gmra.mxu1 %v1267_v12 }
 0x460   :  { %1302 = vmatmul.bf16.vlgmr.msrb.gmra.mxu2 %v1267_v12  ;;  %1315 = vmatmul.bf16.vlgmr.msrb.gmra.mxu3 %v1267_v12 }
 0x4dc   :  { %v1277_v14 = vpop.f32.mrf.mxu0  ;;  %v1290_v28 = vpop.f32.mrf.mxu1 }
 0x4dd   :  { %v1320_v30 = vadd.f32 %v1277_v14, %v2585_v29  ;;  %v1321_v38 = vadd.f32 %v1290_v28, %v2586_v37  ;;  %v2589_v14 = vld [vmem:[#allocation31_spill] sm:$0xff]  ;;  %v2590_v29 = vld [vmem:[#allocation32_spill] sm:$0xff] }
 0x4df   :  { %v1755_v41 = vmul.f32 -1.442695, %v1320_v30  ;;  %v1756_v45 = vmul.f32 -1.442695, %v1321_v38 }
 0x4e1   :  { %1907 = vpow2.f32 %v1755_v41 }
 0x4e2   :  { %1909 = vpow2.f32 %v1756_v45 }
 0x4e3   :  { %v1303_v50 = vpop.f32.mrf.mxu2  ;;  %v1316_v51 = vpop.f32.mrf.mxu3 }
 0x4e4   :  { %v1323_v56 = vadd.f32 %v1316_v51, %v2587_v55  ;;  %v1279_v63 = vpop.f32.mrf.mxu0  ;;  %v1292_v0 = vpop.f32.mrf.mxu1  ;;  %v1322_v36 = vadd.f32 %v1303_v50, %v2588_v35  ;;  %v2591_v50 = vld [vmem:[#allocation34_spill] sm:$0xff] }
 0x4e6   :  { %v1757_v2 = vmul.f32 -1.442695, %v1323_v56 }
 0x4e7   :  { %v1908_v4 = vpop.eup %1907 }
 0x4e8   :  { %v1910_v10 = vpop.eup %1909  ;;  %v1327_v11 = vadd.f32 1.0, %v1908_v4  ;;  %1911 = vpow2.f32 %v1757_v2 }
 0x4e9   :  { %v1346_v15 = vadd.f32 1.0, %v1910_v10 }
 0x4ea   :  { %1913 = vrcp.f32 %v1327_v11  ;;  %v1339_v1 = vand.u32 2147483648, %v1327_v11  ;;  %v1337_v25 = vand.u32 2147483647, %v1327_v11  ;;  %vm1333_vm11 = vweird.f32 %v1327_v11 }
 0x4eb   :  { %1915 = vrcp.f32 %v1346_v15  ;;  %v1305_v21 = vpop.f32.mrf.mxu2  ;;  %v1318_v22 = vpop.f32.mrf.mxu3  ;;  %v1358_v6 = vand.u32 2147483648, %v1346_v15  ;;  %v1356_v47 = vand.u32 2147483647, %v1346_v15  ;;  %vm1352_vm12 = vweird.f32 %v1346_v15 }
 0x4ec   :  { %v1340_v32 = vor.u32 1.1754944e-38, %v1339_v1  ;;  %vm1338_vm15 = vcmp.eq.f32.partialorder %v1337_v25, 8.507059e+37 }
 0x4ed   :  { %v1359_v17 = vor.u32 1.1754944e-38, %v1358_v6  ;;  %vm1357_vm0 = vcmp.eq.f32.partialorder %v1356_v47, 8.507059e+37 }
 0x4ee   :  { %v1912_v23 = vpop.eup %1911 }
 0x4ef   :  { %v1366_v26 = vadd.f32 1.0, %v1912_v23 }
 0x4f0   :  { %v1914_v31 = vpop.eup %1913 }
 0x4f1   :  { %v1916_v43 = vpop.eup %1915  ;;  %v1329_v53 = vmul.f32 %v1914_v31, %v1327_v11  ;;  %1917 = vrcp.f32 %v1366_v26  ;;  %vm1334_vm9 = vweird.f32 %v1914_v31  ;;  %v1378_v40 = vand.u32 2147483648, %v1366_v26 }
 0x4f2   :  { %v1348_v54 = vmul.f32 %v1916_v43, %v1346_v15  ;;  %1919 = vtanh.f32 %v1322_v36  ;;  %vm1353_vm10 = vweird.f32 %v1916_v43  ;;  %vm1335_vm13 = vmor %vm1333_vm11, %vm1334_vm9  ;;  %vm1372_vm2 = vweird.f32 %v1366_v26 }
 0x4f3   :  { %v1330_v57 = vsub.f32 1.0, %v1329_v53  ;;  %vm1354_vm14 = vmor %vm1352_vm12, %vm1353_vm10  ;;  %v1376_v48 = vand.u32 2147483647, %v1366_v26  ;;  %v1379_v18 = vor.u32 1.1754944e-38, %v1378_v40 }
 0x4f4   :  { %v1349_v60 = vsub.f32 1.0, %v1348_v54 }
 0x4f5   :  { %v1331_v8 = vmul.f32 %v1914_v31, %v1330_v57  ;;  %vm1377_vm4 = vcmp.eq.f32.partialorder %v1376_v48, 8.507059e+37 }
 0x4f6   :  { %v1350_v46 = vmul.f32 %v1916_v43, %v1349_v60 }
 0x4f7   :  { %v1918_v16 = vpop.eup %1917  ;;  %v1332_v58 = vadd.f32 %v1914_v31, %v1331_v8 }
 0x4f8   :  { %v1351_v24 = vadd.f32 %v1916_v43, %v1350_v46  ;;  %v1368_v20 = vmul.f32 %v1918_v16, %v1366_v26  ;;  %v1920_v3 = vpop.eup %1919  ;;  %vm1373_vm1 = vweird.f32 %v1918_v16  ;;  %v2592_v26 = vld [vmem:[#allocation33_spill] sm:$0xff] }
 0x4f9   :  { %v1336_v5 = vsel %vm1335_vm13, %v1914_v31, %v1332_v58  ;;  %vm1374_vm3 = vmor %vm1372_vm2, %vm1373_vm1 }
 0x4fa   :  { %v1341_v42 = vsel %vm1338_vm15, %v1340_v32, %v1336_v5  ;;  %v1355_v39 = vsel %vm1354_vm14, %v1916_v43, %v1351_v24  ;;  %v1369_v27 = vsub.f32 1.0, %v1368_v20 }
 0x4fb   :  { %v1360_v33 = vsel %vm1357_vm0, %v1359_v17, %v1355_v39  ;;  %v1383_v7 = vmul.f32 %v1920_v3, %v1341_v42 }
 0x4fc   :  { %v1382_v9 = vmul.f32 %v1360_v33, %v2527_v44  ;;  %v1370_v13 = vmul.f32 %v1918_v16, %v1369_v27 }
 0x4fe   :  { %v2535_v19 = vadd.f32 %v1383_v7, %v1382_v9  ;;  %v1371_v49 = vadd.f32 %v1918_v16, %v1370_v13 }
 0x500   :  { %1921 = vtanh.f32 %v2535_v19  ;;  %v1375_v59 = vsel %vm1374_vm3, %v1918_v16, %v1371_v49 }
 0x501   :  { %v1380_v34 = vsel %vm1377_vm4, %v1379_v18, %v1375_v59 }
 0x506   :  { %v1922_v61 = vpop.eup %1921 }
 0x507   :  { %v1386_v52 = vmul.f32 %v1922_v61, %v1380_v34 }
 0x509   :  { %v1394_v62 = vpack.c.bf16 %v1386_v52, %v1386_v52 }
 0x50b   :  { %1403 = vmatmul.bf16.vlgmr.msra.gmra.mxu0 %v1394_v62  ;;  %1416 = vmatmul.bf16.vlgmr.msra.gmra.mxu1 %v1394_v62 }
 0x50c   :  { %1429 = vmatmul.bf16.vlgmr.msra.gmra.mxu2 %v1394_v62  ;;  %1442 = vmatmul.bf16.vlgmr.msra.gmra.mxu3 %v1394_v62 }
 0x588   :  { %v1404_v44 = vpop.f32.mrf.mxu0  ;;  %v1417_v12 = vpop.f32.mrf.mxu1 }
 0x589   :  { %v1447_v28 = vadd.f32 %v1404_v44, %v2589_v14  ;;  %v1448_v30 = vadd.f32 %v1417_v12, %v2590_v29 }
 0x58b   :  { %v1758_v37 = vmul.f32 -1.442695, %v1447_v28  ;;  %v1759_v38 = vmul.f32 -1.442695, %v1448_v30 }
 0x58d   :  { %1923 = vpow2.f32 %v1758_v37 }
 0x58e   :  { %1925 = vpow2.f32 %v1759_v38 }
 0x58f   :  { %v1430_v41 = vpop.f32.mrf.mxu2  ;;  %v1443_v45 = vpop.f32.mrf.mxu3 }
 0x590   :  { %v1450_v51 = vadd.f32 %v1443_v45, %v2591_v50  ;;  %v1406_v55 = vpop.f32.mrf.mxu0  ;;  %v1419_v56 = vpop.f32.mrf.mxu1  ;;  %v1449_v31 = vadd.f32 %v1430_v41, %v2592_v26 }
 0x592   :  { %v1760_v63 = vmul.f32 -1.442695, %v1450_v51 }
 0x593   :  { %v1924_v0 = vpop.eup %1923 }
 0x594   :  { %v1926_v2 = vpop.eup %1925  ;;  %v1454_v4 = vadd.f32 1.0, %v1924_v0  ;;  %1927 = vpow2.f32 %v1760_v63 }
 0x595   :  { %v1473_v10 = vadd.f32 1.0, %v1926_v2 }
 0x596   :  { %1929 = vrcp.f32 %v1454_v4  ;;  %v1466_v57 = vand.u32 2147483648, %v1454_v4  ;;  %v1464_v6 = vand.u32 2147483647, %v1454_v4  ;;  %vm1460_vm7 = vweird.f32 %v1454_v4 }
 0x597   :  { %1931 = vrcp.f32 %v1473_v10  ;;  %v1432_v11 = vpop.f32.mrf.mxu2  ;;  %v1445_v15 = vpop.f32.mrf.mxu3  ;;  %v1485_v60 = vand.u32 2147483648, %v1473_v10  ;;  %v1483_v25 = vand.u32 2147483647, %v1473_v10  ;;  %vm1479_vm8 = vweird.f32 %v1473_v10 }
 0x598   :  { %v1467_v16 = vor.u32 1.1754944e-38, %v1466_v57  ;;  %vm1465_vm11 = vcmp.eq.f32.partialorder %v1464_v6, 8.507059e+37 }
 0x599   :  { %v1486_v24 = vor.u32 1.1754944e-38, %v1485_v60  ;;  %vm1484_vm12 = vcmp.eq.f32.partialorder %v1483_v25, 8.507059e+37 }
 0x59a   :  { %v1928_v21 = vpop.eup %1927 }
 0x59b   :  { %v1493_v22 = vadd.f32 1.0, %v1928_v21 }
 0x59c   :  { %v1930_v23 = vpop.eup %1929 }
 0x59d   :  { %v1932_v35 = vpop.eup %1931  ;;  %v1456_v36 = vmul.f32 %v1930_v23, %v1454_v4  ;;  %1933 = vrcp.f32 %v1493_v22  ;;  %vm1461_vm5 = vweird.f32 %v1930_v23  ;;  %v1505_v49 = vand.u32 2147483648, %v1493_v22 }
 0x59e   :  { %v1475_v43 = vmul.f32 %v1932_v35, %v1473_v10  ;;  %1935 = vtanh.f32 %v1449_v31  ;;  %vm1480_vm6 = vweird.f32 %v1932_v35  ;;  %vm1462_vm9 = vmor %vm1460_vm7, %vm1461_vm5  ;;  %vm1499_vm14 = vweird.f32 %v1493_v22 }
 0x59f   :  { %v1457_v53 = vsub.f32 1.0, %v1456_v36  ;;  %vm1481_vm10 = vmor %vm1479_vm8, %vm1480_vm6  ;;  %v1503_v40 = vand.u32 2147483647, %v1493_v22  ;;  %v1506_v59 = vor.u32 1.1754944e-38, %v1505_v49 }
 0x5a0   :  { %v1476_v54 = vsub.f32 1.0, %v1475_v43 }
 0x5a1   :  { %v1458_v1 = vmul.f32 %v1930_v23, %v1457_v53  ;;  %vm1504_vm0 = vcmp.eq.f32.partialorder %v1503_v40, 8.507059e+37 }
 0x5a2   :  { %v1477_v8 = vmul.f32 %v1932_v35, %v1476_v54 }
 0x5a3   :  { %v1934_v46 = vpop.eup %1933  ;;  %v1459_v47 = vadd.f32 %v1930_v23, %v1458_v1 }
 0x5a4   :  { %v1478_v58 = vadd.f32 %v1932_v35, %v1477_v8  ;;  %v1495_v32 = vmul.f32 %v1934_v46, %v1493_v22  ;;  %v1936_v17 = vpop.eup %1935  ;;  %vm1500_vm13 = vweird.f32 %v1934_v46 }
 0x5a5   :  { %v1463_v20 = vsel %vm1462_vm9, %v1930_v23, %v1459_v47  ;;  %vm1501_vm15 = vmor %vm1499_vm14, %vm1500_vm13 }
 0x5a6   :  { %v1468_v5 = vsel %vm1465_vm11, %v1467_v16, %v1463_v20  ;;  %v1482_v3 = vsel %vm1481_vm10, %v1932_v35, %v1478_v58  ;;  %v1496_v42 = vsub.f32 1.0, %v1495_v32 }
 0x5a7   :  { %v1487_v39 = vsel %vm1484_vm12, %v1486_v24, %v1482_v3  ;;  %v1510_v27 = vmul.f32 %v1936_v17, %v1468_v5 }
 0x5a8   :  { %v1509_v33 = vmul.f32 %v1487_v39, %v2535_v19  ;;  %v1497_v7 = vmul.f32 %v1934_v46, %v1496_v42 }
 0x5aa   :  { %v1511_v9 = vadd.f32 %v1510_v27, %v1509_v33  ;;  %v1498_v13 = vadd.f32 %v1934_v46, %v1497_v7 }
 0x5ac   :  { %1937 = vtanh.f32 %v1511_v9  ;;  %v1502_v48 = vsel %vm1501_vm15, %v1934_v46, %v1498_v13 }
 0x5ad   :  { %v1507_v19 = vsel %vm1504_vm0, %v1506_v59, %v1502_v48 }
 0x5b2   :  { %v1938_v18 = vpop.eup %1937 }
 0x5b3   :  { %v1513_v61 = vmul.f32 %v1938_v18, %v1507_v19 }
 0x5b5   :  { %1519 = vst [vmem:[#allocation10] sm:$0xff] %v1513_v61 }
 0x5b6   :  { %1530 = dma.vmem_to_hbm [thread:$0]  %s1526_s8, 128, %s1528_s11, [#allocation7]  }
 0x5b7   :  { %2015 = dma.done.wait [#allocation7], 128  }
 0x5b8   :  { %2016 = vsyncadd [#allocation7], 4294967168 }
 0x5b9   :  { %1535 = vsyncpa [#allocation6], 1 }
 0x5ba   :  { %1536 = vsyncpa [#allocation9], 1 }
 0x5bb   :  { %1537 = vsyncpa [#allocation7], 1 }

</bundles_post_ra>
